<compile_context>
chip_gen: v7x
topology: tpu7x:2x2x1
jax: 0.10.0
libtpu: 0.0.40
codegen_flags: <defaults>
</compile_context>

<pallas_src>
import functools

import numpy as np
import jax
import jax.numpy as jnp
from jax import lax
from jax.experimental import pallas as pl
from jax.experimental.pallas import tpu as pltpu

NEG_SLOPE = 0.2
BN_EPS = 1e-5


def _round_up(v, m):
    return ((v + m - 1) // m) * m


# ----------------------------- Pallas kernel --------------------------------
def _subpixel_transconv_kernel(xa_ref, xb_ref, w_ref, shift_ref, o_ref, *, td, HW):
    """One grid step: td input depth planes -> 2*td output planes (all 8 parities).

    xa_ref:    (td, HW, 4*Cin)  bf16  pre-packed in-plane taps for planes d0 .. d0+td-1
    xb_ref:    (1,  HW, 4*Cin)  bf16  plane d0+td (depth halo; zero plane at the boundary)
    w_ref:     (8*Cin, 8*Cout)  bf16  BN-scale-folded sub-pixel weight matrix
    shift_ref: (1, 8*Cout)      f32   BN shift (+ conv bias), tiled per parity
    o_ref:     (td*HW, 8*Cout)  bf16
    """
    cols = o_ref.shape[-1]
    w = w_ref[...]
    # Hoisted: JAX does not CSE broadcast_in_dim, so do the shift broadcast once.
    shift = jnp.broadcast_to(shift_ref[...], (HW, cols))

    for j in range(td):                                     # local output depth plane
        a = xa_ref[j]                                       # (HW, 4*Cin)  depth tap od=0
        b = xa_ref[j + 1] if j + 1 < td else xb_ref[0]      # (HW, 4*Cin)  depth tap od=1
        # Lane-boundary concat -> (HW, 8*Cin); single MXU pass with K = 256.
        patch = jnp.concatenate([a, b], axis=-1)
        acc = jnp.dot(patch, w, preferred_element_type=jnp.float32)

        # Epilogue: folded-BN shift + LeakyReLU(0.2).
        y = acc + shift
        y = jnp.maximum(y, NEG_SLOPE * y)

        # One aligned, full-128-lane, unmasked slab store per plane.
        o_ref[j * HW:(j + 1) * HW, :] = y.astype(o_ref.dtype)


# ------------------------------- weight prep ---------------------------------
def _tap_kernel_index(parity, offset):
    # ConvTranspose3d(k=3, s=2, p=1): output o = 2*i - 1 + k  =>  k = parity - 2*offset + 1
    k = parity - 2 * offset + 1
    return k if 0 <= k <= 2 else None


def _build_subpixel_weight(wt, bias, gamma, beta, mean, var):
    """wt: (Cin, Cout, 3, 3, 3) ConvTranspose3d weight ->
       (8*Cin, 8*Cout) bf16 matrix (BN scale folded in) and (1, 8*Cout) f32 shift."""
    Cin, Cout = wt.shape[0], wt.shape[1]
    scale = gamma / jnp.sqrt(var + BN_EPS)                # (Cout,)
    shift = beta - mean * scale + bias * scale            # (Cout,)  (absorbs conv bias)
    wmat = jnp.zeros((8 * Cin, 8 * Cout), jnp.float32)
    for od in range(2):
        for oh in range(2):
            for ow in range(2):
                t = (od * 2 + oh) * 2 + ow                # tap index (matches patch layout)
                for pd in range(2):
                    for ph in range(2):
                        for pw in range(2):
                            kd = _tap_kernel_index(pd, od)
                            kh = _tap_kernel_index(ph, oh)
                            kw = _tap_kernel_index(pw, ow)
                            if kd is None or kh is None or kw is None:
                                continue
                            p = (pd * 2 + ph) * 2 + pw    # output parity index
                            blk = wt[:, :, kd, kh, kw] * scale[None, :]   # (Cin, Cout)
                            wmat = wmat.at[t * Cin:(t + 1) * Cin,
                                           p * Cout:(p + 1) * Cout].set(blk)
    shift8 = jnp.tile(shift, 8).reshape(1, 8 * Cout)
    return wmat.astype(jnp.bfloat16), shift8.astype(jnp.float32)


# --------------------------------- wrapper ------------------------------------
def trans_conv3d_bn_lrelu(x, wt, bias, gamma, beta, mean, var, *, td=4):
    """x: (N, Cin, D, H, W) NCDHW; wt: (Cin, Cout, 3, 3, 3). Returns (N, Cout, 2D, 2H, 2W)."""
    N, Cin, D, H, W = x.shape
    Cout = wt.shape[1]
    td = min(td, D)
    Dp = _round_up(D, td)                  # pad depth instead of a td=1 fallback
    HW = H * W

    # Cheap, input-sized prep: NCDHW -> NDHWC (bf16), zero halo on D/H/W, then pre-pack
    # the 4 in-plane (oh, ow) taps along channels -> (N, Dp+1, H*W, 4*Cin).
    xh = jnp.transpose(x, (0, 2, 3, 4, 1)).astype(jnp.bfloat16)
    xh = jnp.pad(xh, ((0, 0), (0, Dp - D + 1), (0, 1), (0, 1), (0, 0)))
    taps = [xh[:, :, oh:oh + H, ow:ow + W, :] for oh in (0, 1) for ow in (0, 1)]
    xp = jnp.concatenate(taps, axis=-1).reshape(N, Dp + 1, HW, 4 * Cin)

    wmat, shift = _build_subpixel_weight(wt, bias, gamma, beta, mean, var)

    rows = td * HW                         # 1024 for the demo shapes
    cols = 8 * Cout                        # 128 for the demo shapes (lane-dense stores)
    kernel = functools.partial(_subpixel_transconv_kernel, td=td, HW=HW)

    out = pl.pallas_call(
        kernel,
        out_shape=jax.ShapeDtypeStruct((N, Dp // td, rows, cols), jnp.bfloat16),
        grid_spec=pltpu.PrefetchScalarGridSpec(
            num_scalar_prefetch=0,
            grid=(N, Dp // td),
            in_specs=[
                # td depth planes for this step (block index i -> element offset td*i)
                pl.BlockSpec((None, td, HW, 4 * Cin), lambda n, i: (n, i, 0, 0)),
                # +1 depth halo plane (same array, second view)
                pl.BlockSpec((None, 1, HW, 4 * Cin), lambda n, i: (n, td * (i + 1), 0, 0)),
                pl.BlockSpec((8 * Cin, cols), lambda n, i: (0, 0)),
                pl.BlockSpec((1, cols), lambda n, i: (0, 0)),
            ],
            out_specs=pl.BlockSpec((None, None, rows, cols), lambda n, i: (n, i, 0, 0)),
        ),
        compiler_params=pltpu.CompilerParams(
            dimension_semantics=("parallel", "parallel"),
            vmem_limit_bytes=32 * 1024 * 1024,   # explicit cap; actual per-step use ~1.5 MiB
        ),
    )(xp, xp, wmat, shift)

    # Pixel shuffle on the bf16 output: (N, Dp/td, td*H*W, 8*Cout) -> (N, Cout, 2D, 2H, 2W).
    out = out.reshape(N, Dp // td, td, H, W, 2, 2, 2, Cout)
    out = out.transpose(0, 8, 1, 2, 5, 3, 6, 4, 7)
    out = out.reshape(N, Cout, 2 * Dp, 2 * H, 2 * W)[:, :, :2 * D]
    return out.astype(jnp.float32)


@jax.jit
def trans_conv3d_forward(x, wt, bias, gamma, beta, mean, var):
    return trans_conv3d_bn_lrelu(x, wt, bias, gamma, beta, mean, var, td=4)


# ------------------------------ reference (XLA) -------------------------------
@jax.jit
def trans_conv3d_reference(x, wt, bias, gamma, beta, mean, var):
    xc = jnp.transpose(x, (0, 2, 3, 4, 1))                               # NDHWC
    w_eq = jnp.transpose(wt[:, :, ::-1, ::-1, ::-1], (1, 0, 2, 3, 4))    # (Cout, Cin, 3,3,3)
    w = jnp.transpose(w_eq, (2, 3, 4, 1, 0))                             # DHWIO
    y = lax.conv_general_dilated(
        xc, w, window_strides=(1, 1, 1), padding=((1, 2),) * 3,
        lhs_dilation=(2, 2, 2),
        dimension_numbers=("NDHWC", "DHWIO", "NDHWC"),
        precision=lax.Precision.HIGHEST)
    s = gamma / jnp.sqrt(var + BN_EPS)
    sh = beta - mean * s + bias * s
    y = y * s + sh
    y = jnp.where(y >= 0, y, NEG_SLOPE * y)
    return jnp.transpose(y, (0, 4, 1, 2, 3))


# ----------------------------------- main --------------------------------------
if __name__ == "__main__":
    # Decoder-style upsampling block: 8*Cin = 256 (one full MXU K pass), 8*Cout = 128 lanes.
    in_ch, out_ch = 32, 16
    N, D, H, W = 2, 16, 16, 16

    key = jax.random.PRNGKey(0)
    kx, kw, kb, kg, kbe, km, kv = jax.random.split(key, 7)
    x = jax.random.normal(kx, (N, in_ch, D, H, W), jnp.float32)
    wt = 0.1 * jax.random.normal(kw, (in_ch, out_ch, 3, 3, 3), jnp.float32)
    bias = 0.05 * jax.random.normal(kb, (out_ch,), jnp.float32)
    gamma = 1.0 + 0.1 * jax.random.normal(kg, (out_ch,), jnp.float32)
    beta = 0.1 * jax.random.normal(kbe, (out_ch,), jnp.float32)
    mean = 0.1 * jax.random.normal(km, (out_ch,), jnp.float32)
    var = 1.0 + 0.1 * jax.random.uniform(kv, (out_ch,), jnp.float32)

    out = jax.block_until_ready(trans_conv3d_forward(x, wt, bias, gamma, beta, mean, var))
    assert out.shape == (N, out_ch, 2 * D, 2 * H, 2 * W), out.shape

    # Reference consumes the same bf16-rounded activations the kernel sees; the remaining
    # difference is the bf16 rounding of the folded weights and of the bf16 kernel output.
    x_r = x.astype(jnp.bfloat16).astype(jnp.float32)
    ref = jax.block_until_ready(trans_conv3d_reference(x_r, wt, bias, gamma, beta, mean, var))
    np.testing.assert_allclose(np.asarray(out), np.asarray(ref), rtol=2e-2, atol=2e-2)

    print("KERNEL_OK")
</pallas_src>

<mosaic_0001>
module attributes {stable_mosaic.version = 11 : i64} {
  func.func @_subpixel_transconv_kernel(%arg0: i32, %arg1: i32, %arg2: memref<1x4x256x128xbf16, #tpu.memory_space<vmem>>, %arg3: memref<1x1x256x128xbf16, #tpu.memory_space<vmem>>, %arg4: memref<256x128xbf16, #tpu.memory_space<vmem>>, %arg5: memref<1x128xf32, #tpu.memory_space<vmem>>, %arg6: memref<1x1x1024x128xbf16, #tpu.memory_space<vmem>>) attributes {dimension_semantics = [#tpu.dimension_semantics<parallel>, #tpu.dimension_semantics<parallel>], iteration_bounds = array<i64: 2, 4>, scalar_prefetch = 0 : i64, scratch_operands = 0 : i64, tpu.core_type = #tpu.core_type<tc>, window_params = [{transform_indices = @transform_0, window_bounds = array<i64: 1, 4, 256, 128>}, {transform_indices = @transform_1, window_bounds = array<i64: 1, 1, 256, 128>}, {pipeline_mode = #tpu.pipeline_mode<synchronous>, transform_indices = @transform_2, window_bounds = array<i64: 256, 128>}, {pipeline_mode = #tpu.pipeline_mode<synchronous>, transform_indices = @transform_3, window_bounds = array<i64: 1, 128>}, {transform_indices = @transform_4, window_bounds = array<i64: 1, 1, 1024, 128>}]} {
    %c0 = arith.constant 0 : index
    %c0_0 = arith.constant 0 : index
    %0 = vector.load %arg4[%c0, %c0_0] : memref<256x128xbf16, #tpu.memory_space<vmem>>, vector<256x128xbf16>
    %c0_1 = arith.constant 0 : index
    %c0_2 = arith.constant 0 : index
    %1 = vector.load %arg5[%c0_1, %c0_2] : memref<1x128xf32, #tpu.memory_space<vmem>>, vector<1x128xf32>
    %2 = vector.shape_cast %1 : vector<1x128xf32> to vector<1x128xf32>
    %3 = vector.broadcast %2 : vector<1x128xf32> to vector<256x128xf32>
    %c0_3 = arith.constant 0 : index
    %c0_4 = arith.constant 0 : index
    %c0_5 = arith.constant 0 : index
    %c0_6 = arith.constant 0 : index
    %4 = vector.load %arg2[%c0_3, %c0_4, %c0_5, %c0_6] : memref<1x4x256x128xbf16, #tpu.memory_space<vmem>>, vector<1x1x256x128xbf16>
    %5 = vector.shape_cast %4 : vector<1x1x256x128xbf16> to vector<256x128xbf16>
    %c0_7 = arith.constant 0 : index
    %c1 = arith.constant 1 : index
    %c0_8 = arith.constant 0 : index
    %c0_9 = arith.constant 0 : index
    %6 = vector.load %arg2[%c0_7, %c1, %c0_8, %c0_9] : memref<1x4x256x128xbf16, #tpu.memory_space<vmem>>, vector<1x1x256x128xbf16>
    %7 = vector.shape_cast %6 : vector<1x1x256x128xbf16> to vector<256x128xbf16>
    %8 = tpu.concatenate %5, %7 in 1 : vector<256x128xbf16>, vector<256x128xbf16> -> vector<256x256xbf16>
    %cst = arith.constant dense<0.000000e+00> : vector<256x128xf32>
    %9 = tpu.matmul %8, %0, %cst {dimension_numbers = #tpu.dot_dimension_numbers<[1], [0], [0], [1], [0, 0, 1, 1], [], []>} : vector<256x256xbf16>, vector<256x128xbf16>, vector<256x128xf32> -> vector<256x128xf32>
    %10 = arith.addf %9, %3 : vector<256x128xf32>
    %cst_10 = arith.constant 2.000000e-01 : f32
    %11 = vector.broadcast %cst_10 : f32 to vector<256x128xf32>
    %12 = arith.mulf %11, %10 : vector<256x128xf32>
    %13 = arith.maximumf %10, %12 : vector<256x128xf32>
    %14 = arith.truncf %13 : vector<256x128xf32> to vector<256x128xbf16>
    %c0_11 = arith.constant 0 : index
    %c0_12 = arith.constant 0 : index
    %c0_13 = arith.constant 0 : index
    %c0_14 = arith.constant 0 : index
    %15 = vector.load %arg6[%c0_11, %c0_12, %c0_13, %c0_14] : memref<1x1x1024x128xbf16, #tpu.memory_space<vmem>>, vector<1x1x256x128xbf16>
    %16 = vector.shape_cast %15 : vector<1x1x256x128xbf16> to vector<256x128xbf16>
    %17 = vector.shape_cast %14 : vector<256x128xbf16> to vector<1x1x256x128xbf16>
    tpu.vector_store %arg6[%c0_11, %c0_12, %c0_13, %c0_14], %17 {strides = array<i32>} : memref<1x1x1024x128xbf16, #tpu.memory_space<vmem>>, vector<1x1x256x128xbf16>,
    %c0_15 = arith.constant 0 : index
    %c1_16 = arith.constant 1 : index
    %c0_17 = arith.constant 0 : index
    %c0_18 = arith.constant 0 : index
    %18 = vector.load %arg2[%c0_15, %c1_16, %c0_17, %c0_18] : memref<1x4x256x128xbf16, #tpu.memory_space<vmem>>, vector<1x1x256x128xbf16>
    %19 = vector.shape_cast %18 : vector<1x1x256x128xbf16> to vector<256x128xbf16>
    %c0_19 = arith.constant 0 : index
    %c2 = arith.constant 2 : index
    %c0_20 = arith.constant 0 : index
    %c0_21 = arith.constant 0 : index
    %20 = vector.load %arg2[%c0_19, %c2, %c0_20, %c0_21] : memref<1x4x256x128xbf16, #tpu.memory_space<vmem>>, vector<1x1x256x128xbf16>
    %21 = vector.shape_cast %20 : vector<1x1x256x128xbf16> to vector<256x128xbf16>
    %22 = tpu.concatenate %19, %21 in 1 : vector<256x128xbf16>, vector<256x128xbf16> -> vector<256x256xbf16>
    %cst_22 = arith.constant dense<0.000000e+00> : vector<256x128xf32>
    %23 = tpu.matmul %22, %0, %cst_22 {dimension_numbers = #tpu.dot_dimension_numbers<[1], [0], [0], [1], [0, 0, 1, 1], [], []>} : vector<256x256xbf16>, vector<256x128xbf16>, vector<256x128xf32> -> vector<256x128xf32>
    %24 = arith.addf %23, %3 : vector<256x128xf32>
    %cst_23 = arith.constant 2.000000e-01 : f32
    %25 = vector.broadcast %cst_23 : f32 to vector<256x128xf32>
    %26 = arith.mulf %25, %24 : vector<256x128xf32>
    %27 = arith.maximumf %24, %26 : vector<256x128xf32>
    %28 = arith.truncf %27 : vector<256x128xf32> to vector<256x128xbf16>
    %c0_24 = arith.constant 0 : index
    %c0_25 = arith.constant 0 : index
    %c256 = arith.constant 256 : index
    %c0_26 = arith.constant 0 : index
    %29 = vector.load %arg6[%c0_24, %c0_25, %c256, %c0_26] : memref<1x1x1024x128xbf16, #tpu.memory_space<vmem>>, vector<1x1x256x128xbf16>
    %30 = vector.shape_cast %29 : vector<1x1x256x128xbf16> to vector<256x128xbf16>
    %31 = vector.shape_cast %28 : vector<256x128xbf16> to vector<1x1x256x128xbf16>
    tpu.vector_store %arg6[%c0_24, %c0_25, %c256, %c0_26], %31 {strides = array<i32>} : memref<1x1x1024x128xbf16, #tpu.memory_space<vmem>>, vector<1x1x256x128xbf16>,
    %c0_27 = arith.constant 0 : index
    %c2_28 = arith.constant 2 : index
    %c0_29 = arith.constant 0 : index
    %c0_30 = arith.constant 0 : index
    %32 = vector.load %arg2[%c0_27, %c2_28, %c0_29, %c0_30] : memref<1x4x256x128xbf16, #tpu.memory_space<vmem>>, vector<1x1x256x128xbf16>
    %33 = vector.shape_cast %32 : vector<1x1x256x128xbf16> to vector<256x128xbf16>
    %c0_31 = arith.constant 0 : index
    %c3 = arith.constant 3 : index
    %c0_32 = arith.constant 0 : index
    %c0_33 = arith.constant 0 : index
    %34 = vector.load %arg2[%c0_31, %c3, %c0_32, %c0_33] : memref<1x4x256x128xbf16, #tpu.memory_space<vmem>>, vector<1x1x256x128xbf16>
    %35 = vector.shape_cast %34 : vector<1x1x256x128xbf16> to vector<256x128xbf16>
    %36 = tpu.concatenate %33, %35 in 1 : vector<256x128xbf16>, vector<256x128xbf16> -> vector<256x256xbf16>
    %cst_34 = arith.constant dense<0.000000e+00> : vector<256x128xf32>
    %37 = tpu.matmul %36, %0, %cst_34 {dimension_numbers = #tpu.dot_dimension_numbers<[1], [0], [0], [1], [0, 0, 1, 1], [], []>} : vector<256x256xbf16>, vector<256x128xbf16>, vector<256x128xf32> -> vector<256x128xf32>
    %38 = arith.addf %37, %3 : vector<256x128xf32>
    %cst_35 = arith.constant 2.000000e-01 : f32
    %39 = vector.broadcast %cst_35 : f32 to vector<256x128xf32>
    %40 = arith.mulf %39, %38 : vector<256x128xf32>
    %41 = arith.maximumf %38, %40 : vector<256x128xf32>
    %42 = arith.truncf %41 : vector<256x128xf32> to vector<256x128xbf16>
    %c0_36 = arith.constant 0 : index
    %c0_37 = arith.constant 0 : index
    %c512 = arith.constant 512 : index
    %c0_38 = arith.constant 0 : index
    %43 = vector.load %arg6[%c0_36, %c0_37, %c512, %c0_38] : memref<1x1x1024x128xbf16, #tpu.memory_space<vmem>>, vector<1x1x256x128xbf16>
    %44 = vector.shape_cast %43 : vector<1x1x256x128xbf16> to vector<256x128xbf16>
    %45 = vector.shape_cast %42 : vector<256x128xbf16> to vector<1x1x256x128xbf16>
    tpu.vector_store %arg6[%c0_36, %c0_37, %c512, %c0_38], %45 {strides = array<i32>} : memref<1x1x1024x128xbf16, #tpu.memory_space<vmem>>, vector<1x1x256x128xbf16>,
    %c0_39 = arith.constant 0 : index
    %c3_40 = arith.constant 3 : index
    %c0_41 = arith.constant 0 : index
    %c0_42 = arith.constant 0 : index
    %46 = vector.load %arg2[%c0_39, %c3_40, %c0_41, %c0_42] : memref<1x4x256x128xbf16, #tpu.memory_space<vmem>>, vector<1x1x256x128xbf16>
    %47 = vector.shape_cast %46 : vector<1x1x256x128xbf16> to vector<256x128xbf16>
    %c0_43 = arith.constant 0 : index
    %c0_44 = arith.constant 0 : index
    %c0_45 = arith.constant 0 : index
    %c0_46 = arith.constant 0 : index
    %48 = vector.load %arg3[%c0_43, %c0_44, %c0_45, %c0_46] : memref<1x1x256x128xbf16, #tpu.memory_space<vmem>>, vector<1x1x256x128xbf16>
    %49 = vector.shape_cast %48 : vector<1x1x256x128xbf16> to vector<256x128xbf16>
    %50 = tpu.concatenate %47, %49 in 1 : vector<256x128xbf16>, vector<256x128xbf16> -> vector<256x256xbf16>
    %cst_47 = arith.constant dense<0.000000e+00> : vector<256x128xf32>
    %51 = tpu.matmul %50, %0, %cst_47 {dimension_numbers = #tpu.dot_dimension_numbers<[1], [0], [0], [1], [0, 0, 1, 1], [], []>} : vector<256x256xbf16>, vector<256x128xbf16>, vector<256x128xf32> -> vector<256x128xf32>
    %52 = arith.addf %51, %3 : vector<256x128xf32>
    %cst_48 = arith.constant 2.000000e-01 : f32
    %53 = vector.broadcast %cst_48 : f32 to vector<256x128xf32>
    %54 = arith.mulf %53, %52 : vector<256x128xf32>
    %55 = arith.maximumf %52, %54 : vector<256x128xf32>
    %56 = arith.truncf %55 : vector<256x128xf32> to vector<256x128xbf16>
    %c0_49 = arith.constant 0 : index
    %c0_50 = arith.constant 0 : index
    %c768 = arith.constant 768 : index
    %c0_51 = arith.constant 0 : index
    %57 = vector.load %arg6[%c0_49, %c0_50, %c768, %c0_51] : memref<1x1x1024x128xbf16, #tpu.memory_space<vmem>>, vector<1x1x256x128xbf16>
    %58 = vector.shape_cast %57 : vector<1x1x256x128xbf16> to vector<256x128xbf16>
    %59 = vector.shape_cast %56 : vector<256x128xbf16> to vector<1x1x256x128xbf16>
    tpu.vector_store %arg6[%c0_49, %c0_50, %c768, %c0_51], %59 {strides = array<i32>} : memref<1x1x1024x128xbf16, #tpu.memory_space<vmem>>, vector<1x1x256x128xbf16>,
    return
  }
  func.func @transform_0(%arg0: i32, %arg1: i32) -> (i32, i32, i32, i32) {
    %c0_i32 = arith.constant 0 : i32
    %c0_i32_0 = arith.constant 0 : i32
    %c0_i32_1 = arith.constant 0 : i32
    return %arg0, %arg1, %c0_i32, %c0_i32_0 : i32, i32, i32, i32
  }
  func.func @transform_1(%arg0: i32, %arg1: i32) -> (i32, i32, i32, i32) {
    %c1_i32 = arith.constant 1 : i32
    %0 = arith.addi %arg1, %c1_i32 : i32
    %c4_i32 = arith.constant 4 : i32
    %1 = arith.muli %c4_i32, %0 : i32
    %c0_i32 = arith.constant 0 : i32
    %c0_i32_0 = arith.constant 0 : i32
    %c0_i32_1 = arith.constant 0 : i32
    return %arg0, %1, %c0_i32, %c0_i32_0 : i32, i32, i32, i32
  }
  func.func @transform_2(%arg0: i32, %arg1: i32) -> (i32, i32) {
    %c0_i32 = arith.constant 0 : i32
    %c0_i32_0 = arith.constant 0 : i32
    %c0_i32_1 = arith.constant 0 : i32
    return %c0_i32, %c0_i32_0 : i32, i32
  }
  func.func @transform_3(%arg0: i32, %arg1: i32) -> (i32, i32) {
    %c0_i32 = arith.constant 0 : i32
    %c0_i32_0 = arith.constant 0 : i32
    %c0_i32_1 = arith.constant 0 : i32
    return %c0_i32, %c0_i32_0 : i32, i32
  }
  func.func @transform_4(%arg0: i32, %arg1: i32) -> (i32, i32, i32, i32) {
    %c0_i32 = arith.constant 0 : i32
    %c0_i32_0 = arith.constant 0 : i32
    %c0_i32_1 = arith.constant 0 : i32
    return %arg0, %arg1, %c0_i32, %c0_i32_0 : i32, i32, i32, i32
  }
}

</mosaic_0001>

<bundles_post_ra>
// kernel: tile.8
= control target key start
LH: loop header
LB: loop body
LE: loop exit
PB: predicated region body
PF: predicated region fallthrough
CT: control target
= control target key end

     0   :  { %s22_s0 = inlined_call_operand.vmem [shape: f32[16], index: 0, kind: input, shape index: {}]   ;;  %s23_s1 = inlined_call_operand.vmem [shape: f32[8,16], index: 1, kind: output, shape index: {}]  }
   0x1   :  { %v4_v0 = vld [vmem:[%s22_s0] ss:$0 sm:$0xff] }
   0x2   :  { %5 = vst [vmem:[%s23_s1] sm:$0xff] %v4_v0 }

// kernel: tile.9
= control target key start
LH: loop header
LB: loop body
LE: loop exit
PB: predicated region body
PF: predicated region fallthrough
CT: control target
= control target key end

     0   :  { %s67_s10 = smov 112   ;;  %s68_s11 = smov 80   ;;  %vm3_vm0 = vcmask 130048   ;;  %vm9_vm1 = vcmask 1048448   ;;  %vm15_vm2 = vcmask 917248   ;;  %vm21_vm3 = vcmask 786048   ;;  %s111_s0 = inlined_call_operand.vmem [shape: f32[8,16], index: 0, kind: input, shape index: {}]   ;;  %s112_s1 = inlined_call_operand.vmem [shape: f32[1,128], index: 1, kind: output, shape index: {}]  }
   0x1   :  { %v53_v0 = vld [vmem:[%s111_s0 + $0x7] sm:$0x1]   ;;  %v55_v1 = vld [vmem:[%s111_s0 + $0x5] sm:$0x1]   ;;  %v54_v2 = vld [vmem:[%s111_s0 + $0x6] sm:$0x1]  }
   0x2   :  { %7 = vrot.lane.b32.xlu0 %v53_v0, %s67_s10  ;;  %19 = vrot.lane.b32.xlu1 %v55_v1, %s68_s11  ;;  %v56_v3 = vld [vmem:[%s111_s0 + $0x4] sm:$0x1]   ;;  %v2_v4 = vld [vmem:[%s111_s0] sm:$0x1]   ;;  %s69_s18 = smov 96   ;;  %s70_s19 = smov 64  }
   0x3   :  { %4 = vst.msk [vmem:[#allocation0] sm:$0x1] %vm3_vm0, %v2_v4   ;;  %v57_v5 = vld [vmem:[%s111_s0 + $0x3] sm:$0x1]   ;;  %v58_v6 = vld [vmem:[%s111_s0 + $0x2] sm:$0x1]  }
   0x4   :  { %s71_s24 = smov 48   ;;  %s72_s25 = smov 32   ;;  %v59_v7 = vld [vmem:[%s111_s0 + $0x1] sm:$0x1]   ;;  %vm27_vm4 = vcmask 654848   ;;  %vm33_vm5 = vcmask 523648  }
   0x5   :  { %s73_s0 = smov 16   ;;  %vm39_vm6 = vcmask 392448   ;;  %vm45_vm7 = vcmask 261248  }
   0x6   :  { %13 = vrot.lane.b32.xlu0 %v54_v2, %s69_s18  ;;  %25 = vrot.lane.b32.xlu1 %v56_v3, %s70_s19 }
   0xa   :  { %31 = vrot.lane.b32.xlu0 %v57_v5, %s71_s24  ;;  %37 = vrot.lane.b32.xlu1 %v58_v6, %s72_s25 }
   0xe   :  { %43 = vrot.lane.b32.xlu0 %v59_v7, %s73_s0 }
  0x74   :  { %v8_v8 = vpop.permute.xlu0 %7   ;;  %v20_v9 = vpop.permute.xlu1 %19  }
  0x75   :  { %10 = vst.msk [vmem:[#allocation0] sm:$0x1] %vm9_vm1, %v8_v8  }
  0x78   :  { %v14_v10 = vpop.permute.xlu0 %13   ;;  %v26_v11 = vpop.permute.xlu1 %25  }
  0x79   :  { %16 = vst.msk [vmem:[#allocation0] sm:$0x1] %vm15_vm2, %v14_v10  }
  0x7a   :  { %22 = vst.msk [vmem:[#allocation0] sm:$0x1] %vm21_vm3, %v20_v9  }
  0x7b   :  { %28 = vst.msk [vmem:[#allocation0] sm:$0x1] %vm27_vm4, %v26_v11  }
  0x7c   :  { %v32_v12 = vpop.permute.xlu0 %31   ;;  %v38_v13 = vpop.permute.xlu1 %37  }
  0x7d   :  { %34 = vst.msk [vmem:[#allocation0] sm:$0x1] %vm33_vm5, %v32_v12  }
  0x7e   :  { %40 = vst.msk [vmem:[#allocation0] sm:$0x1] %vm39_vm6, %v38_v13  }
  0x80   :  { %v44_v14 = vpop.permute.xlu0 %43  }
  0x81   :  { %46 = vst.msk [vmem:[#allocation0] sm:$0x1] %vm45_vm7, %v44_v14  }
  0x88   :  { %v50_v15 = vld [vmem:[#allocation0] sm:$0x1] }
  0x89   :  { %52 = vst [vmem:[%s112_s1] sm:$0x1] %v50_v15 }

// kernel: trans_conv3d_forward.1
= control target key start
LH: loop header
LB: loop body
LE: loop exit
PB: predicated region body
PF: predicated region fallthrough
CT: control target
= control target key end

     0   :  { %9 = vsyncpa [#allocation3], 0  ;;  %s5562_s0 = inlined_call_operand.vmem [shape: bf16[2,17,256,128], index: 0, kind: input, shape index: {}, may-alias: {0,1}]   ;;  %s5563_s1 = inlined_call_operand.vmem [shape: bf16[2,17,256,128], index: 1, kind: input, shape index: {}, may-alias: {0,1}]   ;;  %s5564_s2 = inlined_call_operand.vmem [shape: bf16[256,128], index: 2, kind: input, shape index: {}]   ;;  %s5565_s3 = inlined_call_operand.vmem [shape: f32[1,128], index: 3, kind: input, shape index: {}]   ;;  %s5566_s4 = inlined_call_operand.hbm [shape: bf16[2,4,1024,128], index: 4, kind: output, shape index: {}]  }
   0x1   :  { %11 = vsyncpa [#allocation3 + $0x1], 0  ;;  %s4920_s15 = smov 0   ;;  %s4922_s16 = smov 0  }
   0x2   :  { %s4924_s17 = smov 0   ;;  %s4926_s18 = smov 0  }
   0x3   :  { %s4928_s19 = smov 0   ;;  %s4930_s20 = smov 0  }
   0x4   :  { %s4932_s21 = smov 0   ;;  %s4934_s22 = smov 0  }
   0x5 LB: > { %s3127_s23 = sadd.s32 4294967295, %s4890_s22   ;;  %s3128_s24 = sadd.s32 4294967294, %s4890_s22   ;;  %s4890_s22 = sphi %s4934_s22, %s17_s22   ;;  %s4886_s21 = sphi %s4932_s21, %s5575_s21   ;;  %s4882_s20 = sphi %s4930_s20, %s5574_s20   ;;  %s4878_s19 = sphi %s4928_s19, %s5573_s19   ;;  %s4874_s18 = sphi %s4926_s18, %s5572_s18   ;;  %s4870_s17 = sphi %s4924_s17, %s5571_s17   ;;  %s4866_s16 = sphi %s4922_s16, %s5570_s16   ;;  %s4862_s15 = sphi %s4920_s15, %s5569_s15  }
   0x6   : > { %s26_s25 = sadd.s32 1, %s4882_s20  ;;  %s29_s26 = sadd.s32 1, %s4886_s21 }
   0x7   : > { %p27_p0 = scmp.ge.s32.totalorder %s26_s25, 4  ;;  %p150_p1 = scmp.ne.s32.totalorder %s4870_s17, %s4866_s16 }
   0x8   : > { %p151_p2 = scmp.eq.s32.totalorder %s3127_s23, 7  ;;  %p156_p5 = scmp.ne.s32.totalorder %s4866_s16, %s4862_s15 }
   0x9   : > { %s5577_s25 = smov (%p27_p0, %s26_s25), 0  ;;  %s5579_s26 = smov (!%p27_p0, %s29_s26), %s4886_s21 }
   0xa   : > { %s136_s27 = ssub.s32 %s4882_s20, %s5577_s25  ;;  %p4971_p3 = por %p151_p2, %p150_p1 }
   0xb   : > { %p31_p4 = scmp.ge.s32.totalorder %s5579_s26, 2  ;;  %p157_p6 = scmp.eq.s32.totalorder %s3128_s24, 7 }
   0xc   : > { %p3133_p7 = scmp.ge.s32.totalorder %s4890_s22, 1  ;;  %p221_p9 = scmp.lt.s32.totalorder %s4890_s22, 9 }
   0xd   : > { %s5581_s26 = smov (%p31_p4, %s5579_s26), 0  ;;  %p4980_p8 = por %p157_p6, %p156_p5 }
   0xe   : > { %s135_s30 = ssub.s32 %s4886_s21, %s5581_s26  ;;  %s140_s5 = sadd.s32 1, %s4870_s17 }
   0xf   : > { %s137_s6 = sor.u32 %s136_s27, %s135_s30  ;;  %p222_p10 = pnand %p3133_p7, %p221_p9 }
  0x10   : > { %p138_p11 = scmp.eq.s32.totalorder %s137_s6, 0  ;;  %v4994_v0 = vld [vmem:[%s5564_s2 + $0x40] sm:$0xff] (!%p222_p10)   ;;  %s4997_s10 = sshll.u32 (!%p222_p10), %s4874_s18, 2  ;;  %v5010_v2 = vld [vmem:[%s5564_s2 + $0x48] sm:$0xff] (!%p222_p10)   ;;  %v5028_v4 = vld [vmem:[%s5564_s2 + $0x50] sm:$0xff] (!%p222_p10)  }
  0x11   : > { %225 = sbr.rel (%p222_p10) target bundleno = 539 (0x21b), region = 36  ;;  %v5002_v1 = vld [vmem:[%s5564_s2] sm:$0xff] (!%p222_p10)   ;;  %p274_p12 = scmp.lt.s32.totalorder (!%p222_p10), %s4878_s19, 1  ;;  %4129 = vmatprep.subr.bf16.mxu0 (!%p222_p10), %v4994_v0  ;;  %4241 = vmatprep.subr.bf16.mxu1 (!%p222_p10), %v4994_v0  ;;  %v5018_v3 = vld [vmem:[%s5564_s2 + $0x8] sm:$0xff] (!%p222_p10)   ;;  %v5037_v5 = vld [vmem:[%s5564_s2 + $0x10] sm:$0xff] (!%p222_p10)  }
  0x12   : > { %s4989_s7 = scalar_select %p138_p11, %s4870_s17, %s140_s5  }
  0x13   : > { %p276_p13 = scmp.lt.s32.totalorder (!%p222_p10), %s4997_s10, 16  ;;  %4130 = vmatpush3.bf16.msra.mxu0 (!%p222_p10), %v5002_v1  ;;  %4242 = vmatpush3.bf16.msra.mxu1 (!%p222_p10), %v5002_v1  ;;  %v5046_v6 = vld [vmem:[%s5564_s2 + $0x58] sm:$0xff] (!%p222_p10)   ;;  %v5060_v8 = vld [vmem:[%s5564_s2 + $0x60] sm:$0xff] (!%p222_p10)   ;;  %v5077_v10 = vld [vmem:[%s5564_s2 + $0x68] sm:$0xff] (!%p222_p10)   ;;  %s3617_s12 = sadd.s32 (!%p222_p10), 4, %s4997_s10 }
  0x14   : > { %4131 = vmatprep.subr.bf16.mxu0 (!%p222_p10), %v5010_v2  ;;  %4243 = vmatprep.subr.bf16.mxu1 (!%p222_p10), %v5010_v2  ;;  %v5053_v7 = vld [vmem:[%s5564_s2 + $0x18] sm:$0xff] (!%p222_p10)   ;;  %v5070_v9 = vld [vmem:[%s5564_s2 + $0x20] sm:$0xff] (!%p222_p10)   ;;  %v5088_v13 = vld [vmem:[%s5564_s2 + $0x28] sm:$0xff] (!%p222_p10)   ;;  %p293_p0 = scmp.lt.s32.totalorder (!%p222_p10), %s3617_s12, 16  ;;  %s265_s30 = sand.u32 (!%p222_p10), 1, %s4866_s16  }
  0x15   : > { %v5095_v14 = vld [vmem:[%s5564_s2 + $0x70] sm:$0xff] (!%p222_p10)   ;;  %v5110_v16 = vld [vmem:[%s5564_s2 + $0x78] sm:$0xff] (!%p222_p10)   ;;  %s3134_s5 = sshll.u32 (!%p222_p10), %s265_s30, 9  ;;  %s5510_s14 = scalar_lea.sflag (!%p222_p10), [#allocation3], %s265_s30 }
  0x16   : > { %v5103_v15 = vld [vmem:[%s5564_s2 + $0x30] sm:$0xff] (!%p222_p10)   ;;  %v5117_v17 = vld [vmem:[%s5564_s2 + $0x38] sm:$0xff] (!%p222_p10)  }
  0x17   : > { %4132 = vmatpush3.bf16.msra.mxu0 (!%p222_p10), %v5018_v3  ;;  %4244 = vmatpush3.bf16.msra.mxu1 (!%p222_p10), %v5018_v3 }
  0x18   : > { %s5021_s27 = scalar_select %p274_p12, %s4878_s19, 1  ;;  %4133 = vmatprep.subr.bf16.mxu0 %v5028_v4  ;;  %4245 = vmatprep.subr.bf16.mxu1 %v5028_v4 }
  0x19   : > { %s277_s6 = scalar_select %p276_p13, %s4997_s10, 16 }
  0x1a   : > { %s4577_s8 = smul.u32 544, %s5021_s27  ;;  %s5583_s12 = smov (!%p293_p0, %s3617_s12), 16 }
  0x1b   : > { %s3136_s9 = sshll.u32 %s277_s6, 5  ;;  %4134 = vmatpush3.bf16.msra.mxu0 %v5037_v5  ;;  %4246 = vmatpush3.bf16.msra.mxu1 %v5037_v5  ;;  %s3139_s6 = sshll.u32 %s5583_s12, 5 }
  0x1c   : > { %s280_s13 = sadd.s32 %s4577_s8, %s3136_s9  ;;  %4135 = vmatprep.subr.bf16.mxu0 %v5046_v6  ;;  %4247 = vmatprep.subr.bf16.mxu1 %v5046_v6  ;;  %s5123_s9 = sadd.s32 %s4577_s8, %s3139_s6 }
  0x1d   : > { %s3137_s24 = sshll.u32 %s280_s13, 2  ;;  %s3140_s27 = sshll.u32 %s5123_s9, 2 }
  0x1e   : > { %s5065_s13 = scalar_lea.vmem %s5562_s0, %s3137_s24  ;;  %s5191_s12 = scalar_lea.vmem %s5563_s1, %s3140_s27 }
  0x1f   : > { %4136 = vmatpush3.bf16.msra.mxu0 %v5053_v7  ;;  %4248 = vmatpush3.bf16.msra.mxu1 %v5053_v7  ;;  %v4667_v11 = vld [vmem:[%s5065_s13 + $0x80] sm:$0xff]   ;;  %v4671_v20 = vld [vmem:[%s5065_s13 + $0x88] sm:$0xff]   ;;  %v4675_v24 = vld [vmem:[%s5065_s13 + $0x90] sm:$0xff]   ;;  %s5295_s10 = scalar_lea.vmem [#allocation2], %s3134_s5  ;;  %s3607_s6 = sshll.u32 %s4874_s18, 7 }
  0x20   : > { %4137 = vmatprep.subr.bf16.mxu0 %v5060_v8  ;;  %4249 = vmatprep.subr.bf16.mxu1 %v5060_v8  ;;  %v4668_v12 = vld [vmem:[%s5065_s13 + $0x100] sm:$0xff]   ;;  %v4672_v21 = vld [vmem:[%s5065_s13 + $0x108] sm:$0xff]   ;;  %v4676_v25 = vld [vmem:[%s5065_s13 + $0x110] sm:$0xff]   ;;  %s3608_s9 = sshll.u32 %s4878_s19, 9  ;;  %s3021_s19 = sshll.u32 %s5295_s10, 4  ;;  %s5504_s19 = int_to_ptr.vmem [resolvable:$true] %s3021_s19 }
  0x21   : > { %727 = vmatprep.mubr.bf16.mxu0 %v4667_v11  ;;  %1369 = vmatprep.mubr.bf16.mxu1 %v4668_v12  ;;  %v4669_v18 = vld [vmem:[%s5065_s13] sm:$0xff]   ;;  %v4673_v22 = vld [vmem:[%s5065_s13 + $0x8] sm:$0xff]   ;;  %v4677_v26 = vld [vmem:[%s5065_s13 + $0x10] sm:$0xff]   ;;  %s3018_s27 = sadd.s32 %s3608_s9, %s3607_s6  ;;  %s4796_s23 = scalar_lea.vmem %s5504_s19, 8192 }
  0x22   : > { %v4670_v19 = vld [vmem:[%s5065_s13 + $0x80] sm:$0xff]   ;;  %v4674_v23 = vld [vmem:[%s5065_s13 + $0x88] sm:$0xff]   ;;  %v4678_v27 = vld [vmem:[%s5065_s13 + $0x90] sm:$0xff]   ;;  %s3609_s18 = sshll.u32 %s3018_s27, 6  ;;  %p4797_p1 = scmp.ne.s32.totalorder %s5504_s19, %s4796_s23 }
  0x23   : > { %4138 = vmatpush3.bf16.msra.mxu0 %v5070_v9  ;;  %4250 = vmatpush3.bf16.msra.mxu1 %v5070_v9  ;;  %v4679_v28 = vld [vmem:[%s5065_s13 + $0x98] sm:$0xff]   ;;  %v4683_v32 = vld [vmem:[%s5065_s13 + $0xa0] sm:$0xff]   ;;  %v4687_v36 = vld [vmem:[%s5065_s13 + $0xa8] sm:$0xff]   ;;  %s4892_s5 = smov [#allocation2]  }
  0x24   : > { %4139 = vmatprep.subr.bf16.mxu0 %v5077_v10  ;;  %4251 = vmatprep.subr.bf16.mxu1 %v5077_v10  ;;  %v4680_v29 = vld [vmem:[%s5065_s13 + $0x118] sm:$0xff]   ;;  %v4684_v33 = vld [vmem:[%s5065_s13 + $0x120] sm:$0xff]   ;;  %v4688_v37 = vld [vmem:[%s5065_s13 + $0x128] sm:$0xff]   ;;  %p4798_p2 = pnand %p4797_p1, %p4971_p3 }
  0x25   : > { %v4681_v30 = vld [vmem:[%s5065_s13 + $0x18] sm:$0xff]   ;;  %v4685_v34 = vld [vmem:[%s5065_s13 + $0x20] sm:$0xff]   ;;  %v4689_v38 = vld [vmem:[%s5065_s13 + $0x28] sm:$0xff]  }
  0x26   : > { %v4682_v31 = vld [vmem:[%s5065_s13 + $0x98] sm:$0xff]   ;;  %v4686_v35 = vld [vmem:[%s5065_s13 + $0xa0] sm:$0xff]   ;;  %v4690_v39 = vld [vmem:[%s5065_s13 + $0xa8] sm:$0xff]   ;;  %p4799_p4 = pneg %p4798_p2 }
  0x27   : > { %4140 = vmatpush3.bf16.msra.mxu0 %v5088_v13  ;;  %4252 = vmatpush3.bf16.msra.mxu1 %v5088_v13  ;;  %v4691_v40 = vld [vmem:[%s5065_s13 + $0xb0] sm:$0xff]   ;;  %v4695_v44 = vld [vmem:[%s5065_s13 + $0xb8] sm:$0xff]   ;;  %v4699_v48 = vld [vmem:[%s5065_s13 + $0xc0] sm:$0xff]  }
  0x28   : > { %4141 = vmatprep.subr.bf16.mxu0 %v5095_v14  ;;  %4253 = vmatprep.subr.bf16.mxu1 %v5095_v14  ;;  %v4692_v41 = vld [vmem:[%s5065_s13 + $0x130] sm:$0xff]   ;;  %v4696_v45 = vld [vmem:[%s5065_s13 + $0x138] sm:$0xff]   ;;  %v4700_v49 = vld [vmem:[%s5065_s13 + $0x140] sm:$0xff]  }
  0x29   : > { %v4693_v42 = vld [vmem:[%s5065_s13 + $0x30] sm:$0xff]   ;;  %v4697_v46 = vld [vmem:[%s5065_s13 + $0x38] sm:$0xff]   ;;  %v4701_v50 = vld [vmem:[%s5065_s13 + $0x40] sm:$0xff]  }
  0x2a   : > { %v4694_v43 = vld [vmem:[%s5065_s13 + $0xb0] sm:$0xff]   ;;  %v4698_v47 = vld [vmem:[%s5065_s13 + $0xb8] sm:$0xff]   ;;  %v4702_v51 = vld [vmem:[%s5065_s13 + $0xc0] sm:$0xff]  }
  0x2b   : > { %4142 = vmatpush3.bf16.msra.mxu0 %v5103_v15  ;;  %4254 = vmatpush3.bf16.msra.mxu1 %v5103_v15  ;;  %v4703_v52 = vld [vmem:[%s5065_s13 + $0xc8] sm:$0xff]   ;;  %v4707_v56 = vld [vmem:[%s5065_s13 + $0xd0] sm:$0xff]   ;;  %v4711_v60 = vld [vmem:[%s5065_s13 + $0xd8] sm:$0xff]  }
  0x2c   : > { %4143 = vmatprep.subr.bf16.mxu0 %v5110_v16  ;;  %4255 = vmatprep.subr.bf16.mxu1 %v5110_v16  ;;  %v4704_v53 = vld [vmem:[%s5065_s13 + $0x148] sm:$0xff]   ;;  %v4708_v57 = vld [vmem:[%s5065_s13 + $0x150] sm:$0xff]   ;;  %v4712_v61 = vld [vmem:[%s5065_s13 + $0x158] sm:$0xff]  }
  0x2d   : > { %v4705_v54 = vld [vmem:[%s5065_s13 + $0x48] sm:$0xff]   ;;  %v4709_v58 = vld [vmem:[%s5065_s13 + $0x50] sm:$0xff]   ;;  %v4713_v62 = vld [vmem:[%s5065_s13 + $0x58] sm:$0xff]  }
  0x2e   : > { %v4706_v55 = vld [vmem:[%s5065_s13 + $0xc8] sm:$0xff]   ;;  %v4710_v59 = vld [vmem:[%s5065_s13 + $0xd0] sm:$0xff]   ;;  %v4714_v63 = vld [vmem:[%s5065_s13 + $0xd8] sm:$0xff]  }
  0x2f   : > { %4144 = vmatpush3.bf16.msra.mxu0 %v5117_v17  ;;  %4256 = vmatpush3.bf16.msra.mxu1 %v5117_v17  ;;  %v4726_v11 = vld [vmem:[%s5065_s13 + $0xf0] sm:$0xff]   ;;  %v4727_v12 = vld [vmem:[%s5065_s13 + $0xf8] sm:$0xff]  }
  0x30   : > { %4353 = vmatprep.subr.bf16.mxu0 %v4994_v0  ;;  %4465 = vmatprep.subr.bf16.mxu1 %v4994_v0  ;;  %v4715_v0 = vld [vmem:[%s5065_s13 + $0xe0] sm:$0xff]  }
  0x32   : > { %728 = vmatmul.mubr.bf16.vlgmr.msra.gmra.mrb[0].mxu0 %v4669_v18  ;;  %1370 = vmatmul.mubr.bf16.vlgmr.msra.gmra.mrb[0].mxu1 %v4670_v19  ;;  %v4733_v18 = vld [vmem:[%s5065_s13 + $0x100] sm:$0xff]  }
  0x33   : > { %4354 = vmatpush3.bf16.msra.mxu0 %v5002_v1  ;;  %4466 = vmatpush3.bf16.msra.mxu1 %v5002_v1  ;;  %v4716_v1 = vld [vmem:[%s5065_s13 + $0x160] sm:$0xff]  }
  0x34   : > { %735 = vmatprep.mubr.bf16.mxu0 %v4671_v20  ;;  %1377 = vmatprep.mubr.bf16.mxu1 %v4672_v21  ;;  %v4734_v19 = vld [vmem:[%s5065_s13 + $0x180] sm:$0xff]   ;;  %v4735_v20 = vld [vmem:[%s5065_s13 + $0x188] sm:$0xff]  }
  0x35   : > { %4355 = vmatprep.subr.bf16.mxu0 %v5010_v2  ;;  %4467 = vmatprep.subr.bf16.mxu1 %v5010_v2  ;;  %v4717_v2 = vld [vmem:[%s5065_s13 + $0x60] sm:$0xff]   ;;  %v4736_v21 = vld [vmem:[%s5191_s12 + $0x8] sm:$0xff]  }
  0x37   : > { %4356 = vmatpush3.bf16.msra.mxu0 %v5018_v3  ;;  %4468 = vmatpush3.bf16.msra.mxu1 %v5018_v3  ;;  %v4718_v3 = vld [vmem:[%s5065_s13 + $0xe0] sm:$0xff]  }
  0x38   : > { %4357 = vmatprep.subr.bf16.mxu0 %v5028_v4  ;;  %4469 = vmatprep.subr.bf16.mxu1 %v5028_v4  ;;  %v4719_v4 = vld [vmem:[%s5065_s13 + $0xe8] sm:$0xff]  }
  0x3a   : > { %736 = vmatmul.mubr.bf16.gmra.mrb[4].mxu0 %v4673_v22  ;;  %1378 = vmatmul.mubr.bf16.gmra.mrb[4].mxu1 %v4674_v23  ;;  %v4737_v22 = vld [vmem:[%s5065_s13 + $0x108] sm:$0xff]  }
  0x3b   : > { %743 = vmatprep.mubr.bf16.mxu0 %v4675_v24  ;;  %1385 = vmatprep.mubr.bf16.mxu1 %v4676_v25  ;;  %v4738_v23 = vld [vmem:[%s5065_s13 + $0x188] sm:$0xff]   ;;  %v4739_v24 = vld [vmem:[%s5065_s13 + $0x190] sm:$0xff]  }
  0x3c   : > { %4358 = vmatpush3.bf16.msra.mxu0 %v5037_v5  ;;  %4470 = vmatpush3.bf16.msra.mxu1 %v5037_v5  ;;  %v4720_v5 = vld [vmem:[%s5065_s13 + $0x168] sm:$0xff]   ;;  %v4740_v25 = vld [vmem:[%s5191_s12 + $0x10] sm:$0xff]  }
  0x3d   : > { %4359 = vmatprep.subr.bf16.mxu0 %v5046_v6  ;;  %4471 = vmatprep.subr.bf16.mxu1 %v5046_v6  ;;  %v4721_v6 = vld [vmem:[%s5065_s13 + $0x68] sm:$0xff]  }
  0x40   : > { %4360 = vmatpush3.bf16.msra.mxu0 %v5053_v7  ;;  %4472 = vmatpush3.bf16.msra.mxu1 %v5053_v7  ;;  %v4722_v7 = vld [vmem:[%s5065_s13 + $0xe8] sm:$0xff]  }
  0x41   : > { %4361 = vmatprep.subr.bf16.mxu0 %v5060_v8  ;;  %4473 = vmatprep.subr.bf16.mxu1 %v5060_v8  ;;  %v4723_v8 = vld [vmem:[%s5065_s13 + $0xf0] sm:$0xff]  }
  0x42   : > { %744 = vmatmul.mubr.bf16.gmra.mrb[8].mxu0 %v4677_v26  ;;  %1386 = vmatmul.mubr.bf16.gmra.mrb[8].mxu1 %v4678_v27  ;;  %v4741_v26 = vld [vmem:[%s5065_s13 + $0x110] sm:$0xff]  }
  0x43   : > { %751 = vmatprep.mubr.bf16.mxu0 %v4679_v28  ;;  %1393 = vmatprep.mubr.bf16.mxu1 %v4680_v29  ;;  %v4742_v27 = vld [vmem:[%s5065_s13 + $0x190] sm:$0xff]   ;;  %v4743_v28 = vld [vmem:[%s5065_s13 + $0x198] sm:$0xff]  }
  0x44   : > { %4362 = vmatpush3.bf16.msra.mxu0 %v5070_v9  ;;  %4474 = vmatpush3.bf16.msra.mxu1 %v5070_v9  ;;  %v4724_v9 = vld [vmem:[%s5065_s13 + $0x170] sm:$0xff]   ;;  %v4744_v29 = vld [vmem:[%s5191_s12 + $0x18] sm:$0xff]  }
  0x45   : > { %4363 = vmatprep.subr.bf16.mxu0 %v5077_v10  ;;  %4475 = vmatprep.subr.bf16.mxu1 %v5077_v10  ;;  %v4725_v10 = vld [vmem:[%s5065_s13 + $0x70] sm:$0xff]  }
  0x48   : > { %4364 = vmatpush3.bf16.msra.mxu0 %v5088_v13  ;;  %4476 = vmatpush3.bf16.msra.mxu1 %v5088_v13  ;;  %v4728_v13 = vld [vmem:[%s5065_s13 + $0x178] sm:$0xff]  }
  0x49   : > { %4365 = vmatprep.subr.bf16.mxu0 %v5095_v14  ;;  %4477 = vmatprep.subr.bf16.mxu1 %v5095_v14  ;;  %v4729_v14 = vld [vmem:[%s5065_s13 + $0x78] sm:$0xff]  }
  0x4a   : > { %752 = vmatmul.mubr.bf16.gmra.mrb[12].mxu0 %v4681_v30  ;;  %1394 = vmatmul.mubr.bf16.gmra.mrb[12].mxu1 %v4682_v31  ;;  %v4745_v30 = vld [vmem:[%s5065_s13 + $0x118] sm:$0xff]  }
  0x4b   : > { %759 = vmatprep.mubr.bf16.mxu0 %v4683_v32  ;;  %1401 = vmatprep.mubr.bf16.mxu1 %v4684_v33  ;;  %v4746_v31 = vld [vmem:[%s5065_s13 + $0x198] sm:$0xff]   ;;  %v4747_v32 = vld [vmem:[%s5065_s13 + $0x1a0] sm:$0xff]  }
  0x4c   : > { %4366 = vmatpush3.bf16.msra.mxu0 %v5103_v15  ;;  %4478 = vmatpush3.bf16.msra.mxu1 %v5103_v15  ;;  %v4730_v15 = vld [vmem:[%s5065_s13 + $0xf8] sm:$0xff]   ;;  %v4748_v33 = vld [vmem:[%s5191_s12 + $0x20] sm:$0xff]  }
  0x4d   : > { %4367 = vmatprep.subr.bf16.mxu0 %v5110_v16  ;;  %4479 = vmatprep.subr.bf16.mxu1 %v5110_v16  ;;  %v4731_v16 = vld [vmem:[%s5065_s13 + $0x180] sm:$0xff]  }
  0x50   : > { %4368 = vmatpush3.bf16.msra.mxu0 %v5117_v17  ;;  %4480 = vmatpush3.bf16.msra.mxu1 %v5117_v17  ;;  %v4732_v17 = vld [vmem:[%s5191_s12] sm:$0xff]  }
  0x52   : > { %760 = vmatmul.mubr.bf16.gmra.mrb[16].mxu0 %v4685_v34  ;;  %1402 = vmatmul.mubr.bf16.gmra.mrb[16].mxu1 %v4686_v35  ;;  %v4749_v34 = vld [vmem:[%s5065_s13 + $0x120] sm:$0xff]  }
  0x53   : > { %767 = vmatprep.mubr.bf16.mxu0 %v4687_v36  ;;  %1409 = vmatprep.mubr.bf16.mxu1 %v4688_v37  ;;  %v4750_v35 = vld [vmem:[%s5065_s13 + $0x1a0] sm:$0xff]   ;;  %v4751_v36 = vld [vmem:[%s5065_s13 + $0x1a8] sm:$0xff]  }
  0x54   : > { %v4752_v37 = vld [vmem:[%s5191_s12 + $0x28] sm:$0xff]  }
  0x5a   : > { %768 = vmatmul.mubr.bf16.gmra.mrb[20].mxu0 %v4689_v38  ;;  %1410 = vmatmul.mubr.bf16.gmra.mrb[20].mxu1 %v4690_v39  ;;  %v4753_v38 = vld [vmem:[%s5065_s13 + $0x128] sm:$0xff]  }
  0x5b   : > { %775 = vmatprep.mubr.bf16.mxu0 %v4691_v40  ;;  %1417 = vmatprep.mubr.bf16.mxu1 %v4692_v41  ;;  %v4754_v39 = vld [vmem:[%s5065_s13 + $0x1a8] sm:$0xff]   ;;  %v4755_v40 = vld [vmem:[%s5065_s13 + $0x1b0] sm:$0xff]  }
  0x5c   : > { %v4756_v41 = vld [vmem:[%s5191_s12 + $0x30] sm:$0xff]  }
  0x62   : > { %776 = vmatmul.mubr.bf16.gmra.mrb[24].mxu0 %v4693_v42  ;;  %1418 = vmatmul.mubr.bf16.gmra.mrb[24].mxu1 %v4694_v43  ;;  %v4757_v42 = vld [vmem:[%s5065_s13 + $0x130] sm:$0xff]  }
  0x63   : > { %783 = vmatprep.mubr.bf16.mxu0 %v4695_v44  ;;  %1425 = vmatprep.mubr.bf16.mxu1 %v4696_v45  ;;  %v4758_v43 = vld [vmem:[%s5065_s13 + $0x1b0] sm:$0xff]   ;;  %v4759_v44 = vld [vmem:[%s5065_s13 + $0x1b8] sm:$0xff]  }
  0x64   : > { %v4760_v45 = vld [vmem:[%s5191_s12 + $0x38] sm:$0xff]  }
  0x6a   : > { %784 = vmatmul.mubr.bf16.gmra.mrb[28].mxu0 %v4697_v46  ;;  %1426 = vmatmul.mubr.bf16.gmra.mrb[28].mxu1 %v4698_v47  ;;  %v4761_v46 = vld [vmem:[%s5065_s13 + $0x138] sm:$0xff]  }
  0x6b   : > { %791 = vmatprep.mubr.bf16.mxu0 %v4699_v48  ;;  %1433 = vmatprep.mubr.bf16.mxu1 %v4700_v49  ;;  %v4762_v47 = vld [vmem:[%s5065_s13 + $0x1b8] sm:$0xff]   ;;  %v4763_v48 = vld [vmem:[%s5065_s13 + $0x1c0] sm:$0xff]  }
  0x6c   : > { %v4764_v49 = vld [vmem:[%s5191_s12 + $0x40] sm:$0xff]  }
  0x72   : > { %792 = vmatmul.mubr.bf16.gmra.mrb[32].mxu0 %v4701_v50  ;;  %1434 = vmatmul.mubr.bf16.gmra.mrb[32].mxu1 %v4702_v51  ;;  %v4765_v50 = vld [vmem:[%s5065_s13 + $0x140] sm:$0xff]  }
  0x73   : > { %799 = vmatprep.mubr.bf16.mxu0 %v4703_v52  ;;  %1441 = vmatprep.mubr.bf16.mxu1 %v4704_v53  ;;  %v4766_v51 = vld [vmem:[%s5065_s13 + $0x1c0] sm:$0xff]   ;;  %v4767_v52 = vld [vmem:[%s5065_s13 + $0x1c8] sm:$0xff]  }
  0x74   : > { %v4768_v53 = vld [vmem:[%s5191_s12 + $0x48] sm:$0xff]  }
  0x7a   : > { %800 = vmatmul.mubr.bf16.gmra.mrb[36].mxu0 %v4705_v54  ;;  %1442 = vmatmul.mubr.bf16.gmra.mrb[36].mxu1 %v4706_v55  ;;  %v4769_v54 = vld [vmem:[%s5065_s13 + $0x148] sm:$0xff]  }
  0x7b   : > { %807 = vmatprep.mubr.bf16.mxu0 %v4707_v56  ;;  %1449 = vmatprep.mubr.bf16.mxu1 %v4708_v57  ;;  %v4770_v55 = vld [vmem:[%s5065_s13 + $0x1c8] sm:$0xff]   ;;  %v4771_v56 = vld [vmem:[%s5065_s13 + $0x1d0] sm:$0xff]  }
  0x7c   : > { %v4772_v57 = vld [vmem:[%s5191_s12 + $0x50] sm:$0xff]  }
  0x82   : > { %808 = vmatmul.mubr.bf16.gmra.mrb[40].mxu0 %v4709_v58  ;;  %1450 = vmatmul.mubr.bf16.gmra.mrb[40].mxu1 %v4710_v59  ;;  %v4773_v58 = vld [vmem:[%s5065_s13 + $0x150] sm:$0xff]  }
  0x83   : > { %815 = vmatprep.mubr.bf16.mxu0 %v4711_v60  ;;  %1457 = vmatprep.mubr.bf16.mxu1 %v4712_v61  ;;  %v4774_v59 = vld [vmem:[%s5065_s13 + $0x1d0] sm:$0xff]   ;;  %v4775_v60 = vld [vmem:[%s5065_s13 + $0x1d8] sm:$0xff]  }
  0x84   : > { %v4776_v61 = vld [vmem:[%s5191_s12 + $0x58] sm:$0xff]  }
  0x8a   : > { %816 = vmatmul.mubr.bf16.gmra.mrb[44].mxu0 %v4713_v62  ;;  %1458 = vmatmul.mubr.bf16.gmra.mrb[44].mxu1 %v4714_v63 }
  0x8b   : > { %823 = vmatprep.mubr.bf16.mxu0 %v4715_v0  ;;  %1465 = vmatprep.mubr.bf16.mxu1 %v4716_v1  ;;  %v5276_v0 = vld [vmem:[%s5565_s3] ss:$0 sm:$0xff] }
  0x92   : > { %824 = vmatmul.mubr.bf16.gmra.mrb[48].mxu0 %v4717_v2  ;;  %1466 = vmatmul.mubr.bf16.gmra.mrb[48].mxu1 %v4718_v3  ;;  %v4777_v3 = vld [vmem:[%s5065_s13 + $0x158] sm:$0xff]  }
  0x93   : > { %831 = vmatprep.mubr.bf16.mxu0 %v4719_v4  ;;  %1473 = vmatprep.mubr.bf16.mxu1 %v4720_v5  ;;  %v4778_v4 = vld [vmem:[%s5065_s13 + $0x1d8] sm:$0xff]  }
  0x9a   : > { %832 = vmatmul.mubr.bf16.gmra.mrb[52].mxu0 %v4721_v6  ;;  %1474 = vmatmul.mubr.bf16.gmra.mrb[52].mxu1 %v4722_v7 }
  0x9b   : > { %839 = vmatprep.mubr.bf16.mxu0 %v4723_v8  ;;  %1481 = vmatprep.mubr.bf16.mxu1 %v4724_v9  ;;  %v4779_v9 = vld [vmem:[%s5065_s13 + $0x1e0] sm:$0xff]  }
  0xa2   : > { %840 = vmatmul.mubr.bf16.gmra.mrb[56].mxu0 %v4725_v10  ;;  %1482 = vmatmul.mubr.bf16.gmra.mrb[56].mxu1 %v4726_v11  ;;  %v4780_v10 = vld [vmem:[%s5191_s12 + $0x60] sm:$0xff]  }
  0xa3   : > { %847 = vmatprep.mubr.bf16.mxu0 %v4727_v12  ;;  %1489 = vmatprep.mubr.bf16.mxu1 %v4728_v13 }
  0xaa   : > { %848 = vmatmul.mubr.bf16.gmra.mrb[60].mxu0 %v4729_v14  ;;  %1490 = vmatmul.mubr.bf16.gmra.mrb[60].mxu1 %v4730_v15 }
  0xab   : > { %2011 = vmatprep.mubr.bf16.mxu0 %v4731_v16  ;;  %2652 = vmatprep.mubr.bf16.mxu1 %v4732_v17 }
  0xb2   : > { %2012 = vmatmul.mubr.bf16.vlgmr.msra.gmra.mrb[64].mxu0 %v4733_v18  ;;  %2653 = vmatmul.mubr.bf16.vlgmr.msra.gmra.mrb[64].mxu1 %v4734_v19 }
  0xb3   : > { %2019 = vmatprep.mubr.bf16.mxu0 %v4735_v20  ;;  %2660 = vmatprep.mubr.bf16.mxu1 %v4736_v21 }
  0xba   : > { %2020 = vmatmul.mubr.bf16.gmra.mrb[68].mxu0 %v4737_v22  ;;  %2661 = vmatmul.mubr.bf16.gmra.mrb[68].mxu1 %v4738_v23 }
  0xbb   : > { %2027 = vmatprep.mubr.bf16.mxu0 %v4739_v24  ;;  %2668 = vmatprep.mubr.bf16.mxu1 %v4740_v25 }
  0xc2   : > { %2028 = vmatmul.mubr.bf16.gmra.mrb[72].mxu0 %v4741_v26  ;;  %2669 = vmatmul.mubr.bf16.gmra.mrb[72].mxu1 %v4742_v27 }
  0xc3   : > { %2035 = vmatprep.mubr.bf16.mxu0 %v4743_v28  ;;  %2676 = vmatprep.mubr.bf16.mxu1 %v4744_v29  ;;  %v4781_v29 = vld [vmem:[%s5065_s13 + $0x160] sm:$0xff]  }
  0xca   : > { %2036 = vmatmul.mubr.bf16.gmra.mrb[76].mxu0 %v4745_v30  ;;  %2677 = vmatmul.mubr.bf16.gmra.mrb[76].mxu1 %v4746_v31  ;;  %v4782_v30 = vld [vmem:[%s5065_s13 + $0x1e0] sm:$0xff]  }
  0xcb   : > { %2043 = vmatprep.mubr.bf16.mxu0 %v4747_v32  ;;  %2684 = vmatprep.mubr.bf16.mxu1 %v4748_v33 }
  0xd2   : > { %2044 = vmatmul.mubr.bf16.gmra.mrb[80].mxu0 %v4749_v34  ;;  %2685 = vmatmul.mubr.bf16.gmra.mrb[80].mxu1 %v4750_v35 }
  0xd3   : > { %2051 = vmatprep.mubr.bf16.mxu0 %v4751_v36  ;;  %2692 = vmatprep.mubr.bf16.mxu1 %v4752_v37  ;;  %v4783_v37 = vld [vmem:[%s5065_s13 + $0x1e8] sm:$0xff]  }
  0xda   : > { %2052 = vmatmul.mubr.bf16.gmra.mrb[84].mxu0 %v4753_v38  ;;  %2693 = vmatmul.mubr.bf16.gmra.mrb[84].mxu1 %v4754_v39  ;;  %v4784_v38 = vld [vmem:[%s5191_s12 + $0x68] sm:$0xff]  }
  0xdb   : > { %2059 = vmatprep.mubr.bf16.mxu0 %v4755_v40  ;;  %2700 = vmatprep.mubr.bf16.mxu1 %v4756_v41 }
  0xe2   : > { %2060 = vmatmul.mubr.bf16.gmra.mrb[88].mxu0 %v4757_v42  ;;  %2701 = vmatmul.mubr.bf16.gmra.mrb[88].mxu1 %v4758_v43 }
  0xe3   : > { %2067 = vmatprep.mubr.bf16.mxu0 %v4759_v44  ;;  %2708 = vmatprep.mubr.bf16.mxu1 %v4760_v45 }
  0xea   : > { %2068 = vmatmul.mubr.bf16.gmra.mrb[92].mxu0 %v4761_v46  ;;  %2709 = vmatmul.mubr.bf16.gmra.mrb[92].mxu1 %v4762_v47 }
  0xeb   : > { %2075 = vmatprep.mubr.bf16.mxu0 %v4763_v48  ;;  %2716 = vmatprep.mubr.bf16.mxu1 %v4764_v49 }
  0xf2   : > { %2076 = vmatmul.mubr.bf16.gmra.mrb[96].mxu0 %v4765_v50  ;;  %2717 = vmatmul.mubr.bf16.gmra.mrb[96].mxu1 %v4766_v51 }
  0xf3   : > { %2083 = vmatprep.mubr.bf16.mxu0 %v4767_v52  ;;  %2724 = vmatprep.mubr.bf16.mxu1 %v4768_v53  ;;  %v4785_v53 = vld [vmem:[%s5065_s13 + $0x168] sm:$0xff]  }
  0xfa   : > { %2084 = vmatmul.mubr.bf16.gmra.mrb[100].mxu0 %v4769_v54  ;;  %2725 = vmatmul.mubr.bf16.gmra.mrb[100].mxu1 %v4770_v55  ;;  %v4786_v54 = vld [vmem:[%s5065_s13 + $0x1e8] sm:$0xff]  }
  0xfb   : > { %2091 = vmatprep.mubr.bf16.mxu0 %v4771_v56  ;;  %2732 = vmatprep.mubr.bf16.mxu1 %v4772_v57 }
 0x102   : > { %2092 = vmatmul.mubr.bf16.gmra.mrb[104].mxu0 %v4773_v58  ;;  %2733 = vmatmul.mubr.bf16.gmra.mrb[104].mxu1 %v4774_v59 }
 0x103   : > { %2099 = vmatprep.mubr.bf16.mxu0 %v4775_v60  ;;  %2740 = vmatprep.mubr.bf16.mxu1 %v4776_v61 }
 0x105   : > { %v4145_v62 = vpop.f32.mrb[0].mxu0  ;;  %v4257_v63 = vpop.f32.mrb[0].mxu1 }
 0x106   : > { %v4146_v1 = vpop.f32.mrb[1].mxu0  ;;  %v4258_v2 = vpop.f32.mrb[1].mxu1 }
 0x107   : > { %v4147_v5 = vadd.f32 %v4146_v1, %v4145_v62  ;;  %v4259_v6 = vadd.f32 %v4258_v2, %v4257_v63  ;;  %v4148_v7 = vpop.f32.mrb[2].mxu0  ;;  %v4260_v8 = vpop.f32.mrb[2].mxu1  ;;  %v4787_v63 = vld [vmem:[%s5065_s13 + $0x1f0] sm:$0xff]  }
 0x108   : > { %v4149_v11 = vpop.f32.mrb[3].mxu0  ;;  %v4261_v12 = vpop.f32.mrb[3].mxu1  ;;  %v4788_v1 = vld [vmem:[%s5191_s12 + $0x70] sm:$0xff]  }
 0x109   : > { %v730_v13 = vadd.f32 %v4147_v5, %v5276_v0  ;;  %v1372_v14 = vadd.f32 %v4259_v6, %v5276_v0  ;;  %v4150_v15 = vadd.f32 %v4149_v11, %v4148_v7  ;;  %v4262_v16 = vadd.f32 %v4261_v12, %v4260_v8 }
 0x10a   : > { %2100 = vmatmul.mubr.bf16.gmra.mrb[108].mxu0 %v4777_v3  ;;  %2741 = vmatmul.mubr.bf16.gmra.mrb[108].mxu1 %v4778_v4 }
 0x10b   : > { %v856_v17 = vmul.f32 0.2, %v730_v13  ;;  %v1498_v18 = vmul.f32 0.2, %v1372_v14  ;;  %v733_v19 = vadd.f32 %v4150_v15, %v5276_v0  ;;  %v1375_v20 = vadd.f32 %v4262_v16, %v5276_v0  ;;  %2107 = vmatprep.mubr.bf16.mxu0 %v4779_v9  ;;  %2748 = vmatprep.mubr.bf16.mxu1 %v4780_v10 }
 0x10d   : > { %v857_v21 = vmul.f32 0.2, %v733_v19  ;;  %v1499_v22 = vmul.f32 0.2, %v1375_v20  ;;  %v4151_v23 = vpop.f32.mrb[4].mxu0  ;;  %v4263_v24 = vpop.f32.mrb[4].mxu1  ;;  %v888_v25 = vmax.f32 %v730_v13, %v856_v17  ;;  %v1530_v26 = vmax.f32 %v1372_v14, %v1498_v18 }
 0x10e   : > { %v4152_v27 = vpop.f32.mrb[5].mxu0  ;;  %v4264_v28 = vpop.f32.mrb[5].mxu1 }
 0x10f   : > { %v889_v31 = vmax.f32 %v733_v19, %v857_v21  ;;  %v1531_v32 = vmax.f32 %v1375_v20, %v1499_v22  ;;  %v4153_v33 = vadd.f32 %v4152_v27, %v4151_v23  ;;  %v4265_v34 = vadd.f32 %v4264_v28, %v4263_v24  ;;  %v4154_v35 = vpop.f32.mrb[6].mxu0  ;;  %v4266_v36 = vpop.f32.mrb[6].mxu1  ;;  %v4790_v27 = vld [vmem:[%s5065_s13 + $0x1f0] sm:$0xff]  }
 0x110   : > { %v4155_v39 = vpop.f32.mrb[7].mxu0  ;;  %v4267_v40 = vpop.f32.mrb[7].mxu1 }
 0x111   : > { %v3749_v41 = vpack.c.bf16 %v889_v31, %v888_v25  ;;  %v3829_v42 = vpack.c.bf16 %v1531_v32, %v1530_v26  ;;  %v738_v43 = vadd.f32 %v4153_v33, %v5276_v0  ;;  %v1380_v44 = vadd.f32 %v4265_v34, %v5276_v0  ;;  %v4789_v26 = vld [vmem:[%s5065_s13 + $0x170] sm:$0xff]   ;;  %v4791_v34 = vld [vmem:[%s5065_s13 + $0x1f8] sm:$0xff]  }
 0x112   : > { %v4156_v45 = vadd.f32 %v4155_v39, %v4154_v35  ;;  %v4268_v46 = vadd.f32 %v4267_v40, %v4266_v36  ;;  %2108 = vmatmul.mubr.bf16.gmra.mrb[112].mxu0 %v4781_v29  ;;  %2749 = vmatmul.mubr.bf16.gmra.mrb[112].mxu1 %v4782_v30  ;;  %v4792_v35 = vld [vmem:[%s5191_s12 + $0x78] sm:$0xff]   ;;  %s5502_s12 = scalar_lea.hbm %s5566_s4, %s3609_s18 }
 0x113   : > { %3750 = vst [vmem:[%s5295_s10] sm:$0xff] %v3749_v41   ;;  %4081 = vst [vmem:[%s5295_s10 + $0x80] sm:$0xff] %v3829_v42   ;;  %2115 = vmatprep.mubr.bf16.mxu0 %v4783_v37  ;;  %2756 = vmatprep.mubr.bf16.mxu1 %v4784_v38  ;;  %v858_v47 = vmul.f32 0.2, %v738_v43  ;;  %v1500_v48 = vmul.f32 0.2, %v1380_v44 }
 0x114   : > { %v741_v49 = vadd.f32 %v4156_v45, %v5276_v0  ;;  %v1383_v50 = vadd.f32 %v4268_v46, %v5276_v0 }
 0x115   : > { %v4157_v51 = vpop.f32.mrb[8].mxu0  ;;  %v4269_v52 = vpop.f32.mrb[8].mxu1  ;;  %v890_v2 = vmax.f32 %v738_v43, %v858_v47  ;;  %v1532_v3 = vmax.f32 %v1380_v44, %v1500_v48 }
 0x116   : > { %v859_v55 = vmul.f32 0.2, %v741_v49  ;;  %v1501_v56 = vmul.f32 0.2, %v1383_v50  ;;  %v4158_v57 = vpop.f32.mrb[9].mxu0  ;;  %v4270_v58 = vpop.f32.mrb[9].mxu1 }
 0x117   : > { %v4159_v59 = vadd.f32 %v4158_v57, %v4157_v51  ;;  %v4271_v60 = vadd.f32 %v4270_v58, %v4269_v52  ;;  %v4160_v61 = vpop.f32.mrb[10].mxu0  ;;  %v4272_v62 = vpop.f32.mrb[10].mxu1  ;;  %v4794_v51 = vld [vmem:[%s5065_s13 + $0x1f8] sm:$0xff]  }
 0x118   : > { %v891_v4 = vmax.f32 %v741_v49, %v859_v55  ;;  %v1533_v5 = vmax.f32 %v1383_v50, %v1501_v56  ;;  %v4161_v6 = vpop.f32.mrb[11].mxu0  ;;  %v4273_v7 = vpop.f32.mrb[11].mxu1  ;;  %v4793_v50 = vld [vmem:[%s5065_s13 + $0x178] sm:$0xff]   ;;  %s4800_s13 = sshll.u32 %s4892_s5, 4  ;;  %s4801_s13 = int_to_ptr.vmem [resolvable:$false] %s4800_s13 }
 0x119   : > { %v746_v8 = vadd.f32 %v4159_v59, %v5276_v0  ;;  %v1388_v9 = vadd.f32 %v4271_v60, %v5276_v0  ;;  %v4162_v10 = vadd.f32 %v4161_v6, %v4160_v61  ;;  %v4274_v11 = vadd.f32 %v4273_v7, %v4272_v62  ;;  %s4802_s24 = scalar_lea.vmem %s4801_s13, 16384  ;;  %p4803_p5 = scmp.lt.s32.totalorder %s5504_s19, %s4801_s13 }
 0x11a   : > { %v3754_v12 = vpack.c.bf16 %v891_v4, %v890_v2  ;;  %v3834_v13 = vpack.c.bf16 %v1533_v5, %v1532_v3  ;;  %2116 = vmatmul.mubr.bf16.gmra.mrb[116].mxu0 %v4785_v53  ;;  %2757 = vmatmul.mubr.bf16.gmra.mrb[116].mxu1 %v4786_v54  ;;  %p4804_p6 = scmp.lt.s32.totalorder %s4802_s24, %s4796_s23 }
 0x11b   : > { %v860_v14 = vmul.f32 0.2, %v746_v8  ;;  %v1502_v15 = vmul.f32 0.2, %v1388_v9  ;;  %v749_v16 = vadd.f32 %v4162_v10, %v5276_v0  ;;  %v1391_v17 = vadd.f32 %v4274_v11, %v5276_v0  ;;  %2123 = vmatprep.mubr.bf16.mxu0 %v4787_v63  ;;  %2764 = vmatprep.mubr.bf16.mxu1 %v4788_v1 }
 0x11c   : > { %4066 = vst [vmem:[%s5295_s10 + $0x8] sm:$0xff] %v3754_v12   ;;  %4082 = vst [vmem:[%s5295_s10 + $0x88] sm:$0xff] %v3834_v13   ;;  %p4805_p7 = por %p4804_p6, %p4803_p5 }
 0x11d   : > { %v861_v18 = vmul.f32 0.2, %v749_v16  ;;  %v1503_v19 = vmul.f32 0.2, %v1391_v17  ;;  %v4163_v20 = vpop.f32.mrb[12].mxu0  ;;  %v4275_v21 = vpop.f32.mrb[12].mxu1  ;;  %v892_v22 = vmax.f32 %v746_v8, %v860_v14  ;;  %v1534_v23 = vmax.f32 %v1388_v9, %v1502_v15 }
 0x11e   : > { %v4164_v24 = vpop.f32.mrb[13].mxu0  ;;  %v4276_v25 = vpop.f32.mrb[13].mxu1  ;;  %p4806_p9 = pnand %p4805_p7, %p4799_p4 }
 0x11f   : > { %v893_v28 = vmax.f32 %v749_v16, %v861_v18  ;;  %v1535_v29 = vmax.f32 %v1391_v17, %v1503_v19  ;;  %v4165_v30 = vadd.f32 %v4164_v24, %v4163_v20  ;;  %v4277_v31 = vadd.f32 %v4276_v25, %v4275_v21  ;;  %v4166_v32 = vpop.f32.mrb[14].mxu0  ;;  %v4278_v33 = vpop.f32.mrb[14].mxu1 }
 0x120   : > { %v4167_v36 = vpop.f32.mrb[15].mxu0  ;;  %v4279_v37 = vpop.f32.mrb[15].mxu1 }
 0x121   : > { %v3759_v38 = vpack.c.bf16 %v893_v28, %v892_v22  ;;  %v3839_v39 = vpack.c.bf16 %v1535_v29, %v1534_v23  ;;  %v754_v40 = vadd.f32 %v4165_v30, %v5276_v0  ;;  %v1396_v41 = vadd.f32 %v4277_v31, %v5276_v0 }
 0x122   : > { %v4168_v42 = vadd.f32 %v4167_v36, %v4166_v32  ;;  %v4280_v43 = vadd.f32 %v4279_v37, %v4278_v33  ;;  %2124 = vmatmul.mubr.bf16.gmra.mrb[120].mxu0 %v4789_v26  ;;  %2765 = vmatmul.mubr.bf16.gmra.mrb[120].mxu1 %v4790_v27 }
 0x123   : > { %4067 = vst [vmem:[%s5295_s10 + $0x10] sm:$0xff] %v3759_v38   ;;  %4083 = vst [vmem:[%s5295_s10 + $0x90] sm:$0xff] %v3839_v39   ;;  %2131 = vmatprep.mubr.bf16.mxu0 %v4791_v34  ;;  %2772 = vmatprep.mubr.bf16.mxu1 %v4792_v35  ;;  %v862_v44 = vmul.f32 0.2, %v754_v40  ;;  %v1504_v45 = vmul.f32 0.2, %v1396_v41 }
 0x124   : > { %v757_v46 = vadd.f32 %v4168_v42, %v5276_v0  ;;  %v1399_v47 = vadd.f32 %v4280_v43, %v5276_v0 }
 0x125   : > { %v4169_v48 = vpop.f32.mrb[16].mxu0  ;;  %v4281_v49 = vpop.f32.mrb[16].mxu1  ;;  %v894_v60 = vmax.f32 %v754_v40, %v862_v44  ;;  %v1536_v61 = vmax.f32 %v1396_v41, %v1504_v45 }
 0x126   : > { %v863_v52 = vmul.f32 0.2, %v757_v46  ;;  %v1505_v53 = vmul.f32 0.2, %v1399_v47  ;;  %v4170_v54 = vpop.f32.mrb[17].mxu0  ;;  %v4282_v55 = vpop.f32.mrb[17].mxu1 }
 0x127   : > { %v4171_v56 = vadd.f32 %v4170_v54, %v4169_v48  ;;  %v4283_v57 = vadd.f32 %v4282_v55, %v4281_v49  ;;  %v4172_v58 = vpop.f32.mrb[18].mxu0  ;;  %v4284_v59 = vpop.f32.mrb[18].mxu1 }
 0x128   : > { %v895_v62 = vmax.f32 %v757_v46, %v863_v52  ;;  %v1537_v63 = vmax.f32 %v1399_v47, %v1505_v53  ;;  %v4173_v1 = vpop.f32.mrb[19].mxu0  ;;  %v4285_v2 = vpop.f32.mrb[19].mxu1 }
 0x129   : > { %v762_v3 = vadd.f32 %v4171_v56, %v5276_v0  ;;  %v1404_v4 = vadd.f32 %v4283_v57, %v5276_v0  ;;  %v4174_v5 = vadd.f32 %v4173_v1, %v4172_v58  ;;  %v4286_v6 = vadd.f32 %v4285_v2, %v4284_v59 }
 0x12a   : > { %v3764_v7 = vpack.c.bf16 %v895_v62, %v894_v60  ;;  %v3844_v8 = vpack.c.bf16 %v1537_v63, %v1536_v61  ;;  %2132 = vmatmul.mubr.bf16.gmra.mrb[124].mxu0 %v4793_v50  ;;  %2773 = vmatmul.mubr.bf16.gmra.mrb[124].mxu1 %v4794_v51 }
 0x12b   : > { %v864_v9 = vmul.f32 0.2, %v762_v3  ;;  %v1506_v10 = vmul.f32 0.2, %v1404_v4  ;;  %v765_v11 = vadd.f32 %v4174_v5, %v5276_v0  ;;  %v1407_v12 = vadd.f32 %v4286_v6, %v5276_v0 }
 0x12c   : > { %4068 = vst [vmem:[%s5295_s10 + $0x18] sm:$0xff] %v3764_v7   ;;  %4084 = vst [vmem:[%s5295_s10 + $0x98] sm:$0xff] %v3844_v8  }
 0x12d   : > { %v865_v13 = vmul.f32 0.2, %v765_v11  ;;  %v1507_v14 = vmul.f32 0.2, %v1407_v12  ;;  %v4175_v15 = vpop.f32.mrb[20].mxu0  ;;  %v4287_v16 = vpop.f32.mrb[20].mxu1  ;;  %v896_v17 = vmax.f32 %v762_v3, %v864_v9  ;;  %v1538_v18 = vmax.f32 %v1404_v4, %v1506_v10 }
 0x12e   : > { %v4176_v19 = vpop.f32.mrb[21].mxu0  ;;  %v4288_v20 = vpop.f32.mrb[21].mxu1 }
 0x12f   : > { %v897_v21 = vmax.f32 %v765_v11, %v865_v13  ;;  %v1539_v22 = vmax.f32 %v1407_v12, %v1507_v14  ;;  %v4177_v23 = vadd.f32 %v4176_v19, %v4175_v15  ;;  %v4289_v24 = vadd.f32 %v4288_v20, %v4287_v16  ;;  %v4178_v25 = vpop.f32.mrb[22].mxu0  ;;  %v4290_v26 = vpop.f32.mrb[22].mxu1 }
 0x130   : > { %v4179_v27 = vpop.f32.mrb[23].mxu0  ;;  %v4291_v28 = vpop.f32.mrb[23].mxu1 }
 0x131   : > { %v3769_v29 = vpack.c.bf16 %v897_v21, %v896_v17  ;;  %v3849_v30 = vpack.c.bf16 %v1539_v22, %v1538_v18  ;;  %v770_v31 = vadd.f32 %v4177_v23, %v5276_v0  ;;  %v1412_v32 = vadd.f32 %v4289_v24, %v5276_v0 }
 0x132   : > { %v4180_v33 = vadd.f32 %v4179_v27, %v4178_v25  ;;  %v4292_v34 = vadd.f32 %v4291_v28, %v4290_v26 }
 0x133   : > { %4069 = vst [vmem:[%s5295_s10 + $0x20] sm:$0xff] %v3769_v29   ;;  %4085 = vst [vmem:[%s5295_s10 + $0xa0] sm:$0xff] %v3849_v30   ;;  %v866_v35 = vmul.f32 0.2, %v770_v31  ;;  %v1508_v36 = vmul.f32 0.2, %v1412_v32 }
 0x134   : > { %v773_v37 = vadd.f32 %v4180_v33, %v5276_v0  ;;  %v1415_v38 = vadd.f32 %v4292_v34, %v5276_v0 }
 0x135   : > { %v4181_v39 = vpop.f32.mrb[24].mxu0  ;;  %v4293_v40 = vpop.f32.mrb[24].mxu1  ;;  %v898_v49 = vmax.f32 %v770_v31, %v866_v35  ;;  %v1540_v50 = vmax.f32 %v1412_v32, %v1508_v36 }
 0x136   : > { %v867_v41 = vmul.f32 0.2, %v773_v37  ;;  %v1509_v42 = vmul.f32 0.2, %v1415_v38  ;;  %v4182_v43 = vpop.f32.mrb[25].mxu0  ;;  %v4294_v44 = vpop.f32.mrb[25].mxu1 }
 0x137   : > { %v4183_v45 = vadd.f32 %v4182_v43, %v4181_v39  ;;  %v4295_v46 = vadd.f32 %v4294_v44, %v4293_v40  ;;  %v4184_v47 = vpop.f32.mrb[26].mxu0  ;;  %v4296_v48 = vpop.f32.mrb[26].mxu1 }
 0x138   : > { %v899_v51 = vmax.f32 %v773_v37, %v867_v41  ;;  %v1541_v52 = vmax.f32 %v1415_v38, %v1509_v42  ;;  %v4185_v53 = vpop.f32.mrb[27].mxu0  ;;  %v4297_v54 = vpop.f32.mrb[27].mxu1 }
 0x139   : > { %v778_v55 = vadd.f32 %v4183_v45, %v5276_v0  ;;  %v1420_v56 = vadd.f32 %v4295_v46, %v5276_v0  ;;  %v4186_v57 = vadd.f32 %v4185_v53, %v4184_v47  ;;  %v4298_v58 = vadd.f32 %v4297_v54, %v4296_v48 }
 0x13a   : > { %v3774_v59 = vpack.c.bf16 %v899_v51, %v898_v49  ;;  %v3854_v60 = vpack.c.bf16 %v1541_v52, %v1540_v50 }
 0x13b   : > { %v868_v61 = vmul.f32 0.2, %v778_v55  ;;  %v1510_v62 = vmul.f32 0.2, %v1420_v56  ;;  %v781_v63 = vadd.f32 %v4186_v57, %v5276_v0  ;;  %v1423_v1 = vadd.f32 %v4298_v58, %v5276_v0 }
 0x13c   : > { %4070 = vst [vmem:[%s5295_s10 + $0x28] sm:$0xff] %v3774_v59   ;;  %4086 = vst [vmem:[%s5295_s10 + $0xa8] sm:$0xff] %v3854_v60  }
 0x13d   : > { %v869_v2 = vmul.f32 0.2, %v781_v63  ;;  %v1511_v3 = vmul.f32 0.2, %v1423_v1  ;;  %v4187_v4 = vpop.f32.mrb[28].mxu0  ;;  %v4299_v5 = vpop.f32.mrb[28].mxu1  ;;  %v900_v6 = vmax.f32 %v778_v55, %v868_v61  ;;  %v1542_v7 = vmax.f32 %v1420_v56, %v1510_v62 }
 0x13e   : > { %v4188_v8 = vpop.f32.mrb[29].mxu0  ;;  %v4300_v9 = vpop.f32.mrb[29].mxu1 }
 0x13f   : > { %v901_v10 = vmax.f32 %v781_v63, %v869_v2  ;;  %v1543_v11 = vmax.f32 %v1423_v1, %v1511_v3  ;;  %v4189_v12 = vadd.f32 %v4188_v8, %v4187_v4  ;;  %v4301_v13 = vadd.f32 %v4300_v9, %v4299_v5  ;;  %v4190_v14 = vpop.f32.mrb[30].mxu0  ;;  %v4302_v15 = vpop.f32.mrb[30].mxu1 }
 0x140   : > { %v4191_v16 = vpop.f32.mrb[31].mxu0  ;;  %v4303_v17 = vpop.f32.mrb[31].mxu1 }
 0x141   : > { %v3779_v18 = vpack.c.bf16 %v901_v10, %v900_v6  ;;  %v3859_v19 = vpack.c.bf16 %v1543_v11, %v1542_v7  ;;  %v786_v20 = vadd.f32 %v4189_v12, %v5276_v0  ;;  %v1428_v21 = vadd.f32 %v4301_v13, %v5276_v0 }
 0x142   : > { %v4192_v22 = vadd.f32 %v4191_v16, %v4190_v14  ;;  %v4304_v23 = vadd.f32 %v4303_v17, %v4302_v15 }
 0x143   : > { %4071 = vst [vmem:[%s5295_s10 + $0x30] sm:$0xff] %v3779_v18   ;;  %4087 = vst [vmem:[%s5295_s10 + $0xb0] sm:$0xff] %v3859_v19   ;;  %v870_v24 = vmul.f32 0.2, %v786_v20  ;;  %v1512_v25 = vmul.f32 0.2, %v1428_v21 }
 0x144   : > { %v789_v26 = vadd.f32 %v4192_v22, %v5276_v0  ;;  %v1431_v27 = vadd.f32 %v4304_v23, %v5276_v0 }
 0x145   : > { %v4193_v28 = vpop.f32.mrb[32].mxu0  ;;  %v4305_v29 = vpop.f32.mrb[32].mxu1  ;;  %v902_v38 = vmax.f32 %v786_v20, %v870_v24  ;;  %v1544_v39 = vmax.f32 %v1428_v21, %v1512_v25 }
 0x146   : > { %v871_v30 = vmul.f32 0.2, %v789_v26  ;;  %v1513_v31 = vmul.f32 0.2, %v1431_v27  ;;  %v4194_v32 = vpop.f32.mrb[33].mxu0  ;;  %v4306_v33 = vpop.f32.mrb[33].mxu1 }
 0x147   : > { %v4195_v34 = vadd.f32 %v4194_v32, %v4193_v28  ;;  %v4307_v35 = vadd.f32 %v4306_v33, %v4305_v29  ;;  %v4196_v36 = vpop.f32.mrb[34].mxu0  ;;  %v4308_v37 = vpop.f32.mrb[34].mxu1 }
 0x148   : > { %v903_v40 = vmax.f32 %v789_v26, %v871_v30  ;;  %v1545_v41 = vmax.f32 %v1431_v27, %v1513_v31  ;;  %v4197_v42 = vpop.f32.mrb[35].mxu0  ;;  %v4309_v43 = vpop.f32.mrb[35].mxu1 }
 0x149   : > { %v794_v44 = vadd.f32 %v4195_v34, %v5276_v0  ;;  %v1436_v45 = vadd.f32 %v4307_v35, %v5276_v0  ;;  %v4198_v46 = vadd.f32 %v4197_v42, %v4196_v36  ;;  %v4310_v47 = vadd.f32 %v4309_v43, %v4308_v37 }
 0x14a   : > { %v3784_v48 = vpack.c.bf16 %v903_v40, %v902_v38  ;;  %v3864_v49 = vpack.c.bf16 %v1545_v41, %v1544_v39 }
 0x14b   : > { %v872_v50 = vmul.f32 0.2, %v794_v44  ;;  %v1514_v51 = vmul.f32 0.2, %v1436_v45  ;;  %v797_v52 = vadd.f32 %v4198_v46, %v5276_v0  ;;  %v1439_v53 = vadd.f32 %v4310_v47, %v5276_v0 }
 0x14c   : > { %4072 = vst [vmem:[%s5295_s10 + $0x38] sm:$0xff] %v3784_v48   ;;  %4088 = vst [vmem:[%s5295_s10 + $0xb8] sm:$0xff] %v3864_v49  }
 0x14d   : > { %v873_v54 = vmul.f32 0.2, %v797_v52  ;;  %v1515_v55 = vmul.f32 0.2, %v1439_v53  ;;  %v4199_v56 = vpop.f32.mrb[36].mxu0  ;;  %v4311_v57 = vpop.f32.mrb[36].mxu1  ;;  %v904_v58 = vmax.f32 %v794_v44, %v872_v50  ;;  %v1546_v59 = vmax.f32 %v1436_v45, %v1514_v51 }
 0x14e   : > { %v4200_v60 = vpop.f32.mrb[37].mxu0  ;;  %v4312_v61 = vpop.f32.mrb[37].mxu1 }
 0x14f   : > { %v905_v62 = vmax.f32 %v797_v52, %v873_v54  ;;  %v1547_v63 = vmax.f32 %v1439_v53, %v1515_v55  ;;  %v4201_v1 = vadd.f32 %v4200_v60, %v4199_v56  ;;  %v4313_v2 = vadd.f32 %v4312_v61, %v4311_v57  ;;  %v4202_v3 = vpop.f32.mrb[38].mxu0  ;;  %v4314_v4 = vpop.f32.mrb[38].mxu1 }
 0x150   : > { %v4203_v5 = vpop.f32.mrb[39].mxu0  ;;  %v4315_v6 = vpop.f32.mrb[39].mxu1 }
 0x151   : > { %v3789_v7 = vpack.c.bf16 %v905_v62, %v904_v58  ;;  %v3869_v8 = vpack.c.bf16 %v1547_v63, %v1546_v59  ;;  %v802_v9 = vadd.f32 %v4201_v1, %v5276_v0  ;;  %v1444_v10 = vadd.f32 %v4313_v2, %v5276_v0 }
 0x152   : > { %v4204_v11 = vadd.f32 %v4203_v5, %v4202_v3  ;;  %v4316_v12 = vadd.f32 %v4315_v6, %v4314_v4 }
 0x153   : > { %4073 = vst [vmem:[%s5295_s10 + $0x40] sm:$0xff] %v3789_v7   ;;  %4089 = vst [vmem:[%s5295_s10 + $0xc0] sm:$0xff] %v3869_v8   ;;  %v874_v13 = vmul.f32 0.2, %v802_v9  ;;  %v1516_v14 = vmul.f32 0.2, %v1444_v10 }
 0x154   : > { %v805_v15 = vadd.f32 %v4204_v11, %v5276_v0  ;;  %v1447_v16 = vadd.f32 %v4316_v12, %v5276_v0 }
 0x155   : > { %v4205_v17 = vpop.f32.mrb[40].mxu0  ;;  %v4317_v18 = vpop.f32.mrb[40].mxu1  ;;  %v906_v27 = vmax.f32 %v802_v9, %v874_v13  ;;  %v1548_v28 = vmax.f32 %v1444_v10, %v1516_v14 }
 0x156   : > { %v875_v19 = vmul.f32 0.2, %v805_v15  ;;  %v1517_v20 = vmul.f32 0.2, %v1447_v16  ;;  %v4206_v21 = vpop.f32.mrb[41].mxu0  ;;  %v4318_v22 = vpop.f32.mrb[41].mxu1 }
 0x157   : > { %v4207_v23 = vadd.f32 %v4206_v21, %v4205_v17  ;;  %v4319_v24 = vadd.f32 %v4318_v22, %v4317_v18  ;;  %v4208_v25 = vpop.f32.mrb[42].mxu0  ;;  %v4320_v26 = vpop.f32.mrb[42].mxu1 }
 0x158   : > { %v907_v29 = vmax.f32 %v805_v15, %v875_v19  ;;  %v1549_v30 = vmax.f32 %v1447_v16, %v1517_v20  ;;  %v4209_v31 = vpop.f32.mrb[43].mxu0  ;;  %v4321_v32 = vpop.f32.mrb[43].mxu1 }
 0x159   : > { %v810_v33 = vadd.f32 %v4207_v23, %v5276_v0  ;;  %v1452_v34 = vadd.f32 %v4319_v24, %v5276_v0  ;;  %v4210_v35 = vadd.f32 %v4209_v31, %v4208_v25  ;;  %v4322_v36 = vadd.f32 %v4321_v32, %v4320_v26 }
 0x15a   : > { %v3794_v37 = vpack.c.bf16 %v907_v29, %v906_v27  ;;  %v3874_v38 = vpack.c.bf16 %v1549_v30, %v1548_v28 }
 0x15b   : > { %v876_v39 = vmul.f32 0.2, %v810_v33  ;;  %v1518_v40 = vmul.f32 0.2, %v1452_v34  ;;  %v813_v41 = vadd.f32 %v4210_v35, %v5276_v0  ;;  %v1455_v42 = vadd.f32 %v4322_v36, %v5276_v0 }
 0x15c   : > { %4074 = vst [vmem:[%s5295_s10 + $0x48] sm:$0xff] %v3794_v37   ;;  %4090 = vst [vmem:[%s5295_s10 + $0xc8] sm:$0xff] %v3874_v38  }
 0x15d   : > { %v877_v43 = vmul.f32 0.2, %v813_v41  ;;  %v1519_v44 = vmul.f32 0.2, %v1455_v42  ;;  %v4211_v45 = vpop.f32.mrb[44].mxu0  ;;  %v4323_v46 = vpop.f32.mrb[44].mxu1  ;;  %v908_v47 = vmax.f32 %v810_v33, %v876_v39  ;;  %v1550_v48 = vmax.f32 %v1452_v34, %v1518_v40 }
 0x15e   : > { %v4212_v49 = vpop.f32.mrb[45].mxu0  ;;  %v4324_v50 = vpop.f32.mrb[45].mxu1 }
 0x15f   : > { %v909_v51 = vmax.f32 %v813_v41, %v877_v43  ;;  %v1551_v52 = vmax.f32 %v1455_v42, %v1519_v44  ;;  %v4213_v53 = vadd.f32 %v4212_v49, %v4211_v45  ;;  %v4325_v54 = vadd.f32 %v4324_v50, %v4323_v46  ;;  %v4214_v55 = vpop.f32.mrb[46].mxu0  ;;  %v4326_v56 = vpop.f32.mrb[46].mxu1 }
 0x160   : > { %v4215_v57 = vpop.f32.mrb[47].mxu0  ;;  %v4327_v58 = vpop.f32.mrb[47].mxu1 }
 0x161   : > { %v3799_v59 = vpack.c.bf16 %v909_v51, %v908_v47  ;;  %v3879_v60 = vpack.c.bf16 %v1551_v52, %v1550_v48  ;;  %v818_v61 = vadd.f32 %v4213_v53, %v5276_v0  ;;  %v1460_v62 = vadd.f32 %v4325_v54, %v5276_v0 }
 0x162   : > { %v4216_v63 = vadd.f32 %v4215_v57, %v4214_v55  ;;  %v4328_v1 = vadd.f32 %v4327_v58, %v4326_v56 }
 0x163   : > { %4075 = vst [vmem:[%s5295_s10 + $0x50] sm:$0xff] %v3799_v59   ;;  %4091 = vst [vmem:[%s5295_s10 + $0xd0] sm:$0xff] %v3879_v60   ;;  %v878_v2 = vmul.f32 0.2, %v818_v61  ;;  %v1520_v3 = vmul.f32 0.2, %v1460_v62 }
 0x164   : > { %v821_v4 = vadd.f32 %v4216_v63, %v5276_v0  ;;  %v1463_v5 = vadd.f32 %v4328_v1, %v5276_v0 }
 0x165   : > { %v4217_v6 = vpop.f32.mrb[48].mxu0  ;;  %v4329_v7 = vpop.f32.mrb[48].mxu1  ;;  %v910_v16 = vmax.f32 %v818_v61, %v878_v2  ;;  %v1552_v17 = vmax.f32 %v1460_v62, %v1520_v3 }
 0x166   : > { %v879_v8 = vmul.f32 0.2, %v821_v4  ;;  %v1521_v9 = vmul.f32 0.2, %v1463_v5  ;;  %v4218_v10 = vpop.f32.mrb[49].mxu0  ;;  %v4330_v11 = vpop.f32.mrb[49].mxu1 }
 0x167   : > { %v4219_v12 = vadd.f32 %v4218_v10, %v4217_v6  ;;  %v4331_v13 = vadd.f32 %v4330_v11, %v4329_v7  ;;  %v4220_v14 = vpop.f32.mrb[50].mxu0  ;;  %v4332_v15 = vpop.f32.mrb[50].mxu1 }
 0x168   : > { %v911_v18 = vmax.f32 %v821_v4, %v879_v8  ;;  %v1553_v19 = vmax.f32 %v1463_v5, %v1521_v9  ;;  %v4221_v20 = vpop.f32.mrb[51].mxu0  ;;  %v4333_v21 = vpop.f32.mrb[51].mxu1 }
 0x169   : > { %v826_v22 = vadd.f32 %v4219_v12, %v5276_v0  ;;  %v1468_v23 = vadd.f32 %v4331_v13, %v5276_v0  ;;  %v4222_v24 = vadd.f32 %v4221_v20, %v4220_v14  ;;  %v4334_v25 = vadd.f32 %v4333_v21, %v4332_v15 }
 0x16a   : > { %v3804_v26 = vpack.c.bf16 %v911_v18, %v910_v16  ;;  %v3884_v27 = vpack.c.bf16 %v1553_v19, %v1552_v17 }
 0x16b   : > { %v880_v28 = vmul.f32 0.2, %v826_v22  ;;  %v1522_v29 = vmul.f32 0.2, %v1468_v23  ;;  %v829_v30 = vadd.f32 %v4222_v24, %v5276_v0  ;;  %v1471_v31 = vadd.f32 %v4334_v25, %v5276_v0 }
 0x16c   : > { %4076 = vst [vmem:[%s5295_s10 + $0x58] sm:$0xff] %v3804_v26   ;;  %4092 = vst [vmem:[%s5295_s10 + $0xd8] sm:$0xff] %v3884_v27  }
 0x16d   : > { %v881_v32 = vmul.f32 0.2, %v829_v30  ;;  %v1523_v33 = vmul.f32 0.2, %v1471_v31  ;;  %v4223_v34 = vpop.f32.mrb[52].mxu0  ;;  %v4335_v35 = vpop.f32.mrb[52].mxu1  ;;  %v912_v36 = vmax.f32 %v826_v22, %v880_v28  ;;  %v1554_v37 = vmax.f32 %v1468_v23, %v1522_v29 }
 0x16e   : > { %v4224_v38 = vpop.f32.mrb[53].mxu0  ;;  %v4336_v39 = vpop.f32.mrb[53].mxu1 }
 0x16f   : > { %v913_v40 = vmax.f32 %v829_v30, %v881_v32  ;;  %v1555_v41 = vmax.f32 %v1471_v31, %v1523_v33  ;;  %v4225_v42 = vadd.f32 %v4224_v38, %v4223_v34  ;;  %v4337_v43 = vadd.f32 %v4336_v39, %v4335_v35  ;;  %v4226_v44 = vpop.f32.mrb[54].mxu0  ;;  %v4338_v45 = vpop.f32.mrb[54].mxu1 }
 0x170   : > { %v4227_v46 = vpop.f32.mrb[55].mxu0  ;;  %v4339_v47 = vpop.f32.mrb[55].mxu1 }
 0x171   : > { %v3809_v48 = vpack.c.bf16 %v913_v40, %v912_v36  ;;  %v3889_v49 = vpack.c.bf16 %v1555_v41, %v1554_v37  ;;  %v834_v50 = vadd.f32 %v4225_v42, %v5276_v0  ;;  %v1476_v51 = vadd.f32 %v4337_v43, %v5276_v0 }
 0x172   : > { %v4228_v52 = vadd.f32 %v4227_v46, %v4226_v44  ;;  %v4340_v53 = vadd.f32 %v4339_v47, %v4338_v45 }
 0x173   : > { %4077 = vst [vmem:[%s5295_s10 + $0x60] sm:$0xff] %v3809_v48   ;;  %4093 = vst [vmem:[%s5295_s10 + $0xe0] sm:$0xff] %v3889_v49   ;;  %v882_v54 = vmul.f32 0.2, %v834_v50  ;;  %v1524_v55 = vmul.f32 0.2, %v1476_v51 }
 0x174   : > { %v837_v56 = vadd.f32 %v4228_v52, %v5276_v0  ;;  %v1479_v57 = vadd.f32 %v4340_v53, %v5276_v0 }
 0x175   : > { %v4229_v58 = vpop.f32.mrb[56].mxu0  ;;  %v4341_v59 = vpop.f32.mrb[56].mxu1  ;;  %v914_v5 = vmax.f32 %v834_v50, %v882_v54  ;;  %v1556_v6 = vmax.f32 %v1476_v51, %v1524_v55 }
 0x176   : > { %v883_v60 = vmul.f32 0.2, %v837_v56  ;;  %v1525_v61 = vmul.f32 0.2, %v1479_v57  ;;  %v4230_v62 = vpop.f32.mrb[57].mxu0  ;;  %v4342_v63 = vpop.f32.mrb[57].mxu1 }
 0x177   : > { %v4231_v1 = vadd.f32 %v4230_v62, %v4229_v58  ;;  %v4343_v2 = vadd.f32 %v4342_v63, %v4341_v59  ;;  %v4232_v3 = vpop.f32.mrb[58].mxu0  ;;  %v4344_v4 = vpop.f32.mrb[58].mxu1 }
 0x178   : > { %v915_v7 = vmax.f32 %v837_v56, %v883_v60  ;;  %v1557_v8 = vmax.f32 %v1479_v57, %v1525_v61  ;;  %v4233_v9 = vpop.f32.mrb[59].mxu0  ;;  %v4345_v10 = vpop.f32.mrb[59].mxu1 }
 0x179   : > { %v842_v11 = vadd.f32 %v4231_v1, %v5276_v0  ;;  %v1484_v12 = vadd.f32 %v4343_v2, %v5276_v0  ;;  %v4234_v13 = vadd.f32 %v4233_v9, %v4232_v3  ;;  %v4346_v14 = vadd.f32 %v4345_v10, %v4344_v4 }
 0x17a   : > { %v3814_v15 = vpack.c.bf16 %v915_v7, %v914_v5  ;;  %v3894_v16 = vpack.c.bf16 %v1557_v8, %v1556_v6 }
 0x17b   : > { %v884_v17 = vmul.f32 0.2, %v842_v11  ;;  %v1526_v18 = vmul.f32 0.2, %v1484_v12  ;;  %v845_v19 = vadd.f32 %v4234_v13, %v5276_v0  ;;  %v1487_v20 = vadd.f32 %v4346_v14, %v5276_v0 }
 0x17c   : > { %4078 = vst [vmem:[%s5295_s10 + $0x68] sm:$0xff] %v3814_v15   ;;  %4094 = vst [vmem:[%s5295_s10 + $0xe8] sm:$0xff] %v3894_v16  }
 0x17d   : > { %v885_v21 = vmul.f32 0.2, %v845_v19  ;;  %v1527_v22 = vmul.f32 0.2, %v1487_v20  ;;  %v4235_v23 = vpop.f32.mrb[60].mxu0  ;;  %v4347_v24 = vpop.f32.mrb[60].mxu1  ;;  %v916_v25 = vmax.f32 %v842_v11, %v884_v17  ;;  %v1558_v26 = vmax.f32 %v1484_v12, %v1526_v18 }
 0x17e   : > { %v4236_v27 = vpop.f32.mrb[61].mxu0  ;;  %v4348_v28 = vpop.f32.mrb[61].mxu1 }
 0x17f   : > { %v917_v29 = vmax.f32 %v845_v19, %v885_v21  ;;  %v1559_v30 = vmax.f32 %v1487_v20, %v1527_v22  ;;  %v4237_v31 = vadd.f32 %v4236_v27, %v4235_v23  ;;  %v4349_v32 = vadd.f32 %v4348_v28, %v4347_v24  ;;  %v4238_v33 = vpop.f32.mrb[62].mxu0  ;;  %v4350_v34 = vpop.f32.mrb[62].mxu1  ;;  %v5404_v27 = vld [vmem:[%s5565_s3] ss:$0 sm:$0xff] }
 0x180   : > { %v4239_v35 = vpop.f32.mrb[63].mxu0  ;;  %v4351_v36 = vpop.f32.mrb[63].mxu1 }
 0x181   : > { %v3819_v37 = vpack.c.bf16 %v917_v29, %v916_v25  ;;  %v3899_v38 = vpack.c.bf16 %v1559_v30, %v1558_v26  ;;  %v850_v39 = vadd.f32 %v4237_v31, %v5276_v0  ;;  %v1492_v40 = vadd.f32 %v4349_v32, %v5276_v0 }
 0x182   : > { %v4240_v41 = vadd.f32 %v4239_v35, %v4238_v33  ;;  %v4352_v42 = vadd.f32 %v4351_v36, %v4350_v34 }
 0x183   : > { %4079 = vst [vmem:[%s5295_s10 + $0x70] sm:$0xff] %v3819_v37   ;;  %4095 = vst [vmem:[%s5295_s10 + $0xf0] sm:$0xff] %v3899_v38   ;;  %v886_v43 = vmul.f32 0.2, %v850_v39  ;;  %v1528_v44 = vmul.f32 0.2, %v1492_v40 }
 0x184   : > { %v853_v45 = vadd.f32 %v4240_v41, %v5276_v0  ;;  %v1495_v46 = vadd.f32 %v4352_v42, %v5276_v0 }
 0x185   : > { %v4369_v47 = vpop.f32.mrb[64].mxu0  ;;  %v4481_v48 = vpop.f32.mrb[64].mxu1  ;;  %v918_v57 = vmax.f32 %v850_v39, %v886_v43  ;;  %v1560_v58 = vmax.f32 %v1492_v40, %v1528_v44 }
 0x186   : > { %v887_v49 = vmul.f32 0.2, %v853_v45  ;;  %v1529_v50 = vmul.f32 0.2, %v1495_v46  ;;  %v4370_v51 = vpop.f32.mrb[65].mxu0  ;;  %v4482_v52 = vpop.f32.mrb[65].mxu1 }
 0x187   : > { %v4371_v53 = vadd.f32 %v4370_v51, %v4369_v47  ;;  %v4483_v54 = vadd.f32 %v4482_v52, %v4481_v48  ;;  %v4372_v55 = vpop.f32.mrb[66].mxu0  ;;  %v4484_v56 = vpop.f32.mrb[66].mxu1 }
 0x188   : > { %v919_v59 = vmax.f32 %v853_v45, %v887_v49  ;;  %v1561_v60 = vmax.f32 %v1495_v46, %v1529_v50  ;;  %v4373_v61 = vpop.f32.mrb[67].mxu0  ;;  %v4485_v62 = vpop.f32.mrb[67].mxu1 }
 0x189   : > { %v2014_v63 = vadd.f32 %v4371_v53, %v5276_v0  ;;  %v2655_v1 = vadd.f32 %v4483_v54, %v5276_v0  ;;  %v4374_v2 = vadd.f32 %v4373_v61, %v4372_v55  ;;  %v4486_v3 = vadd.f32 %v4485_v62, %v4484_v56 }
 0x18a   : > { %v3824_v4 = vpack.c.bf16 %v919_v59, %v918_v57  ;;  %v3904_v5 = vpack.c.bf16 %v1561_v60, %v1560_v58 }
 0x18b   : > { %v2140_v6 = vmul.f32 0.2, %v2014_v63  ;;  %v2781_v7 = vmul.f32 0.2, %v2655_v1  ;;  %v2017_v8 = vadd.f32 %v4374_v2, %v5276_v0  ;;  %v2658_v9 = vadd.f32 %v4486_v3, %v5276_v0 }
 0x18c   : > { %4080 = vst [vmem:[%s5295_s10 + $0x78] sm:$0xff] %v3824_v4   ;;  %4096 = vst [vmem:[%s5295_s10 + $0xf8] sm:$0xff] %v3904_v5  }
 0x18d   : > { %v2141_v10 = vmul.f32 0.2, %v2017_v8  ;;  %v2782_v11 = vmul.f32 0.2, %v2658_v9  ;;  %v4375_v12 = vpop.f32.mrb[68].mxu0  ;;  %v4487_v13 = vpop.f32.mrb[68].mxu1  ;;  %v2172_v14 = vmax.f32 %v2014_v63, %v2140_v6  ;;  %v2813_v15 = vmax.f32 %v2655_v1, %v2781_v7 }
 0x18e   : > { %v4376_v16 = vpop.f32.mrb[69].mxu0  ;;  %v4488_v17 = vpop.f32.mrb[69].mxu1 }
 0x18f   : > { %v2173_v18 = vmax.f32 %v2017_v8, %v2141_v10  ;;  %v2814_v19 = vmax.f32 %v2658_v9, %v2782_v11  ;;  %v4377_v20 = vadd.f32 %v4376_v16, %v4375_v12  ;;  %v4489_v21 = vadd.f32 %v4488_v17, %v4487_v13  ;;  %v4378_v22 = vpop.f32.mrb[70].mxu0  ;;  %v4490_v23 = vpop.f32.mrb[70].mxu1 }
 0x190   : > { %v4379_v24 = vpop.f32.mrb[71].mxu0  ;;  %v4491_v0 = vpop.f32.mrb[71].mxu1 }
 0x191   : > { %v3909_v25 = vpack.c.bf16 %v2173_v18, %v2172_v14  ;;  %v3989_v26 = vpack.c.bf16 %v2814_v19, %v2813_v15  ;;  %v2022_v28 = vadd.f32 %v5404_v27, %v4377_v20  ;;  %v2663_v29 = vadd.f32 %v5404_v27, %v4489_v21 }
 0x192   : > { %v4380_v30 = vadd.f32 %v4379_v24, %v4378_v22  ;;  %v4492_v31 = vadd.f32 %v4491_v0, %v4490_v23 }
 0x193   : > { %4097 = vst [vmem:[%s5295_s10 + $0x100] sm:$0xff] %v3909_v25   ;;  %4113 = vst [vmem:[%s5295_s10 + $0x180] sm:$0xff] %v3989_v26   ;;  %v2142_v32 = vmul.f32 0.2, %v2022_v28  ;;  %v2783_v33 = vmul.f32 0.2, %v2663_v29 }
 0x194   : > { %v2025_v34 = vadd.f32 %v5404_v27, %v4380_v30  ;;  %v2666_v35 = vadd.f32 %v5404_v27, %v4492_v31 }
 0x195   : > { %v4381_v36 = vpop.f32.mrb[72].mxu0  ;;  %v4493_v37 = vpop.f32.mrb[72].mxu1  ;;  %v2174_v46 = vmax.f32 %v2022_v28, %v2142_v32  ;;  %v2815_v47 = vmax.f32 %v2663_v29, %v2783_v33 }
 0x196   : > { %v2143_v38 = vmul.f32 0.2, %v2025_v34  ;;  %v2784_v39 = vmul.f32 0.2, %v2666_v35  ;;  %v4382_v40 = vpop.f32.mrb[73].mxu0  ;;  %v4494_v41 = vpop.f32.mrb[73].mxu1 }
 0x197   : > { %v4383_v42 = vadd.f32 %v4382_v40, %v4381_v36  ;;  %v4495_v43 = vadd.f32 %v4494_v41, %v4493_v37  ;;  %v4384_v44 = vpop.f32.mrb[74].mxu0  ;;  %v4496_v45 = vpop.f32.mrb[74].mxu1 }
 0x198   : > { %v2175_v48 = vmax.f32 %v2025_v34, %v2143_v38  ;;  %v2816_v49 = vmax.f32 %v2666_v35, %v2784_v39  ;;  %v4385_v50 = vpop.f32.mrb[75].mxu0  ;;  %v4497_v51 = vpop.f32.mrb[75].mxu1 }
 0x199   : > { %v2030_v52 = vadd.f32 %v5404_v27, %v4383_v42  ;;  %v2671_v53 = vadd.f32 %v5404_v27, %v4495_v43  ;;  %v4386_v54 = vadd.f32 %v4385_v50, %v4384_v44  ;;  %v4498_v55 = vadd.f32 %v4497_v51, %v4496_v45 }
 0x19a   : > { %v3914_v56 = vpack.c.bf16 %v2175_v48, %v2174_v46  ;;  %v3994_v57 = vpack.c.bf16 %v2816_v49, %v2815_v47 }
 0x19b   : > { %v2144_v58 = vmul.f32 0.2, %v2030_v52  ;;  %v2785_v59 = vmul.f32 0.2, %v2671_v53  ;;  %v2033_v60 = vadd.f32 %v5404_v27, %v4386_v54  ;;  %v2674_v61 = vadd.f32 %v5404_v27, %v4498_v55 }
 0x19c   : > { %4098 = vst [vmem:[%s5295_s10 + $0x108] sm:$0xff] %v3914_v56   ;;  %4114 = vst [vmem:[%s5295_s10 + $0x188] sm:$0xff] %v3994_v57  }
 0x19d   : > { %v2145_v62 = vmul.f32 0.2, %v2033_v60  ;;  %v2786_v63 = vmul.f32 0.2, %v2674_v61  ;;  %v4387_v1 = vpop.f32.mrb[76].mxu0  ;;  %v4499_v2 = vpop.f32.mrb[76].mxu1  ;;  %v2176_v3 = vmax.f32 %v2030_v52, %v2144_v58  ;;  %v2817_v4 = vmax.f32 %v2671_v53, %v2785_v59 }
 0x19e   : > { %v4388_v5 = vpop.f32.mrb[77].mxu0  ;;  %v4500_v6 = vpop.f32.mrb[77].mxu1 }
 0x19f   : > { %v2177_v7 = vmax.f32 %v2033_v60, %v2145_v62  ;;  %v2818_v8 = vmax.f32 %v2674_v61, %v2786_v63  ;;  %v4389_v9 = vadd.f32 %v4388_v5, %v4387_v1  ;;  %v4501_v10 = vadd.f32 %v4500_v6, %v4499_v2  ;;  %v4390_v11 = vpop.f32.mrb[78].mxu0  ;;  %v4502_v12 = vpop.f32.mrb[78].mxu1 }
 0x1a0   : > { %v4391_v13 = vpop.f32.mrb[79].mxu0  ;;  %v4503_v14 = vpop.f32.mrb[79].mxu1 }
 0x1a1   : > { %v3919_v15 = vpack.c.bf16 %v2177_v7, %v2176_v3  ;;  %v3999_v16 = vpack.c.bf16 %v2818_v8, %v2817_v4  ;;  %v2038_v17 = vadd.f32 %v5404_v27, %v4389_v9  ;;  %v2679_v18 = vadd.f32 %v5404_v27, %v4501_v10 }
 0x1a2   : > { %v4392_v19 = vadd.f32 %v4391_v13, %v4390_v11  ;;  %v4504_v20 = vadd.f32 %v4503_v14, %v4502_v12 }
 0x1a3   : > { %4099 = vst [vmem:[%s5295_s10 + $0x110] sm:$0xff] %v3919_v15   ;;  %4115 = vst [vmem:[%s5295_s10 + $0x190] sm:$0xff] %v3999_v16   ;;  %v2146_v21 = vmul.f32 0.2, %v2038_v17  ;;  %v2787_v22 = vmul.f32 0.2, %v2679_v18 }
 0x1a4   : > { %v2041_v23 = vadd.f32 %v5404_v27, %v4392_v19  ;;  %v2682_v24 = vadd.f32 %v5404_v27, %v4504_v20 }
 0x1a5   : > { %v4393_v0 = vpop.f32.mrb[80].mxu0  ;;  %v4505_v25 = vpop.f32.mrb[80].mxu1  ;;  %v2178_v35 = vmax.f32 %v2038_v17, %v2146_v21  ;;  %v2819_v36 = vmax.f32 %v2679_v18, %v2787_v22 }
 0x1a6   : > { %v2147_v26 = vmul.f32 0.2, %v2041_v23  ;;  %v2788_v28 = vmul.f32 0.2, %v2682_v24  ;;  %v4394_v29 = vpop.f32.mrb[81].mxu0  ;;  %v4506_v30 = vpop.f32.mrb[81].mxu1 }
 0x1a7   : > { %v4395_v31 = vadd.f32 %v4394_v29, %v4393_v0  ;;  %v4507_v32 = vadd.f32 %v4506_v30, %v4505_v25  ;;  %v4396_v33 = vpop.f32.mrb[82].mxu0  ;;  %v4508_v34 = vpop.f32.mrb[82].mxu1 }
 0x1a8   : > { %v2179_v37 = vmax.f32 %v2041_v23, %v2147_v26  ;;  %v2820_v38 = vmax.f32 %v2682_v24, %v2788_v28  ;;  %v4397_v39 = vpop.f32.mrb[83].mxu0  ;;  %v4509_v40 = vpop.f32.mrb[83].mxu1 }
 0x1a9   : > { %v2046_v41 = vadd.f32 %v5404_v27, %v4395_v31  ;;  %v2687_v42 = vadd.f32 %v5404_v27, %v4507_v32  ;;  %v4398_v43 = vadd.f32 %v4397_v39, %v4396_v33  ;;  %v4510_v44 = vadd.f32 %v4509_v40, %v4508_v34 }
 0x1aa   : > { %v3924_v45 = vpack.c.bf16 %v2179_v37, %v2178_v35  ;;  %v4004_v46 = vpack.c.bf16 %v2820_v38, %v2819_v36 }
 0x1ab   : > { %v2148_v47 = vmul.f32 0.2, %v2046_v41  ;;  %v2789_v48 = vmul.f32 0.2, %v2687_v42  ;;  %v2049_v49 = vadd.f32 %v5404_v27, %v4398_v43  ;;  %v2690_v50 = vadd.f32 %v5404_v27, %v4510_v44 }
 0x1ac   : > { %4100 = vst [vmem:[%s5295_s10 + $0x118] sm:$0xff] %v3924_v45   ;;  %4116 = vst [vmem:[%s5295_s10 + $0x198] sm:$0xff] %v4004_v46  }
 0x1ad   : > { %v2149_v51 = vmul.f32 0.2, %v2049_v49  ;;  %v2790_v52 = vmul.f32 0.2, %v2690_v50  ;;  %v4399_v53 = vpop.f32.mrb[84].mxu0  ;;  %v4511_v54 = vpop.f32.mrb[84].mxu1  ;;  %v2180_v55 = vmax.f32 %v2046_v41, %v2148_v47  ;;  %v2821_v56 = vmax.f32 %v2687_v42, %v2789_v48 }
 0x1ae   : > { %v4400_v57 = vpop.f32.mrb[85].mxu0  ;;  %v4512_v58 = vpop.f32.mrb[85].mxu1 }
 0x1af   : > { %v2181_v59 = vmax.f32 %v2049_v49, %v2149_v51  ;;  %v2822_v60 = vmax.f32 %v2690_v50, %v2790_v52  ;;  %v4401_v61 = vadd.f32 %v4400_v57, %v4399_v53  ;;  %v4513_v62 = vadd.f32 %v4512_v58, %v4511_v54  ;;  %v4402_v63 = vpop.f32.mrb[86].mxu0  ;;  %v4514_v1 = vpop.f32.mrb[86].mxu1 }
 0x1b0   : > { %v4403_v2 = vpop.f32.mrb[87].mxu0  ;;  %v4515_v3 = vpop.f32.mrb[87].mxu1 }
 0x1b1   : > { %v3929_v4 = vpack.c.bf16 %v2181_v59, %v2180_v55  ;;  %v4009_v5 = vpack.c.bf16 %v2822_v60, %v2821_v56  ;;  %v2054_v6 = vadd.f32 %v5404_v27, %v4401_v61  ;;  %v2695_v7 = vadd.f32 %v5404_v27, %v4513_v62 }
 0x1b2   : > { %v4404_v8 = vadd.f32 %v4403_v2, %v4402_v63  ;;  %v4516_v9 = vadd.f32 %v4515_v3, %v4514_v1 }
 0x1b3   : > { %4101 = vst [vmem:[%s5295_s10 + $0x120] sm:$0xff] %v3929_v4   ;;  %4117 = vst [vmem:[%s5295_s10 + $0x1a0] sm:$0xff] %v4009_v5   ;;  %v2150_v10 = vmul.f32 0.2, %v2054_v6  ;;  %v2791_v11 = vmul.f32 0.2, %v2695_v7 }
 0x1b4   : > { %v2057_v12 = vadd.f32 %v5404_v27, %v4404_v8  ;;  %v2698_v13 = vadd.f32 %v5404_v27, %v4516_v9 }
 0x1b5   : > { %v4405_v14 = vpop.f32.mrb[88].mxu0  ;;  %v4517_v15 = vpop.f32.mrb[88].mxu1  ;;  %v2182_v24 = vmax.f32 %v2054_v6, %v2150_v10  ;;  %v2823_v0 = vmax.f32 %v2695_v7, %v2791_v11 }
 0x1b6   : > { %v2151_v16 = vmul.f32 0.2, %v2057_v12  ;;  %v2792_v17 = vmul.f32 0.2, %v2698_v13  ;;  %v4406_v18 = vpop.f32.mrb[89].mxu0  ;;  %v4518_v19 = vpop.f32.mrb[89].mxu1 }
 0x1b7   : > { %v4407_v20 = vadd.f32 %v4406_v18, %v4405_v14  ;;  %v4519_v21 = vadd.f32 %v4518_v19, %v4517_v15  ;;  %v4408_v22 = vpop.f32.mrb[90].mxu0  ;;  %v4520_v23 = vpop.f32.mrb[90].mxu1 }
 0x1b8   : > { %v2183_v25 = vmax.f32 %v2057_v12, %v2151_v16  ;;  %v2824_v26 = vmax.f32 %v2698_v13, %v2792_v17  ;;  %v4409_v28 = vpop.f32.mrb[91].mxu0  ;;  %v4521_v29 = vpop.f32.mrb[91].mxu1 }
 0x1b9   : > { %v2062_v30 = vadd.f32 %v5404_v27, %v4407_v20  ;;  %v2703_v31 = vadd.f32 %v5404_v27, %v4519_v21  ;;  %v4410_v32 = vadd.f32 %v4409_v28, %v4408_v22  ;;  %v4522_v33 = vadd.f32 %v4521_v29, %v4520_v23 }
 0x1ba   : > { %v3934_v34 = vpack.c.bf16 %v2183_v25, %v2182_v24  ;;  %v4014_v35 = vpack.c.bf16 %v2824_v26, %v2823_v0 }
 0x1bb   : > { %v2152_v36 = vmul.f32 0.2, %v2062_v30  ;;  %v2793_v37 = vmul.f32 0.2, %v2703_v31  ;;  %v2065_v38 = vadd.f32 %v5404_v27, %v4410_v32  ;;  %v2706_v39 = vadd.f32 %v5404_v27, %v4522_v33 }
 0x1bc   : > { %4102 = vst [vmem:[%s5295_s10 + $0x128] sm:$0xff] %v3934_v34   ;;  %4118 = vst [vmem:[%s5295_s10 + $0x1a8] sm:$0xff] %v4014_v35  }
 0x1bd   : > { %v2153_v40 = vmul.f32 0.2, %v2065_v38  ;;  %v2794_v41 = vmul.f32 0.2, %v2706_v39  ;;  %v4411_v42 = vpop.f32.mrb[92].mxu0  ;;  %v4523_v43 = vpop.f32.mrb[92].mxu1  ;;  %v2184_v44 = vmax.f32 %v2062_v30, %v2152_v36  ;;  %v2825_v45 = vmax.f32 %v2703_v31, %v2793_v37 }
 0x1be   : > { %v4412_v46 = vpop.f32.mrb[93].mxu0  ;;  %v4524_v47 = vpop.f32.mrb[93].mxu1 }
 0x1bf   : > { %v2185_v48 = vmax.f32 %v2065_v38, %v2153_v40  ;;  %v2826_v49 = vmax.f32 %v2706_v39, %v2794_v41  ;;  %v4413_v50 = vadd.f32 %v4412_v46, %v4411_v42  ;;  %v4525_v51 = vadd.f32 %v4524_v47, %v4523_v43  ;;  %v4414_v52 = vpop.f32.mrb[94].mxu0  ;;  %v4526_v53 = vpop.f32.mrb[94].mxu1 }
 0x1c0   : > { %v4415_v54 = vpop.f32.mrb[95].mxu0  ;;  %v4527_v55 = vpop.f32.mrb[95].mxu1 }
 0x1c1   : > { %v3939_v56 = vpack.c.bf16 %v2185_v48, %v2184_v44  ;;  %v4019_v57 = vpack.c.bf16 %v2826_v49, %v2825_v45  ;;  %v2070_v58 = vadd.f32 %v5404_v27, %v4413_v50  ;;  %v2711_v59 = vadd.f32 %v5404_v27, %v4525_v51 }
 0x1c2   : > { %v4416_v60 = vadd.f32 %v4415_v54, %v4414_v52  ;;  %v4528_v61 = vadd.f32 %v4527_v55, %v4526_v53 }
 0x1c3   : > { %4103 = vst [vmem:[%s5295_s10 + $0x130] sm:$0xff] %v3939_v56   ;;  %4119 = vst [vmem:[%s5295_s10 + $0x1b0] sm:$0xff] %v4019_v57   ;;  %v2154_v62 = vmul.f32 0.2, %v2070_v58  ;;  %v2795_v63 = vmul.f32 0.2, %v2711_v59 }
 0x1c4   : > { %v2073_v1 = vadd.f32 %v5404_v27, %v4416_v60  ;;  %v2714_v2 = vadd.f32 %v5404_v27, %v4528_v61 }
 0x1c5   : > { %v4417_v3 = vpop.f32.mrb[96].mxu0  ;;  %v4529_v4 = vpop.f32.mrb[96].mxu1  ;;  %v2186_v13 = vmax.f32 %v2070_v58, %v2154_v62  ;;  %v2827_v14 = vmax.f32 %v2711_v59, %v2795_v63 }
 0x1c6   : > { %v2155_v5 = vmul.f32 0.2, %v2073_v1  ;;  %v2796_v6 = vmul.f32 0.2, %v2714_v2  ;;  %v4418_v7 = vpop.f32.mrb[97].mxu0  ;;  %v4530_v8 = vpop.f32.mrb[97].mxu1 }
 0x1c7   : > { %v4419_v9 = vadd.f32 %v4418_v7, %v4417_v3  ;;  %v4531_v10 = vadd.f32 %v4530_v8, %v4529_v4  ;;  %v4420_v11 = vpop.f32.mrb[98].mxu0  ;;  %v4532_v12 = vpop.f32.mrb[98].mxu1 }
 0x1c8   : > { %v2187_v15 = vmax.f32 %v2073_v1, %v2155_v5  ;;  %v2828_v16 = vmax.f32 %v2714_v2, %v2796_v6  ;;  %v4421_v17 = vpop.f32.mrb[99].mxu0  ;;  %v4533_v18 = vpop.f32.mrb[99].mxu1 }
 0x1c9   : > { %v2078_v19 = vadd.f32 %v5404_v27, %v4419_v9  ;;  %v2719_v20 = vadd.f32 %v5404_v27, %v4531_v10  ;;  %v4422_v21 = vadd.f32 %v4421_v17, %v4420_v11  ;;  %v4534_v22 = vadd.f32 %v4533_v18, %v4532_v12 }
 0x1ca   : > { %v3944_v23 = vpack.c.bf16 %v2187_v15, %v2186_v13  ;;  %v4024_v24 = vpack.c.bf16 %v2828_v16, %v2827_v14 }
 0x1cb   : > { %v2156_v0 = vmul.f32 0.2, %v2078_v19  ;;  %v2797_v25 = vmul.f32 0.2, %v2719_v20  ;;  %v2081_v26 = vadd.f32 %v5404_v27, %v4422_v21  ;;  %v2722_v28 = vadd.f32 %v5404_v27, %v4534_v22 }
 0x1cc   : > { %4104 = vst [vmem:[%s5295_s10 + $0x138] sm:$0xff] %v3944_v23   ;;  %4120 = vst [vmem:[%s5295_s10 + $0x1b8] sm:$0xff] %v4024_v24  }
 0x1cd   : > { %v2157_v29 = vmul.f32 0.2, %v2081_v26  ;;  %v2798_v30 = vmul.f32 0.2, %v2722_v28  ;;  %v4423_v31 = vpop.f32.mrb[100].mxu0  ;;  %v4535_v32 = vpop.f32.mrb[100].mxu1  ;;  %v2188_v33 = vmax.f32 %v2078_v19, %v2156_v0  ;;  %v2829_v34 = vmax.f32 %v2719_v20, %v2797_v25 }
 0x1ce   : > { %v4424_v35 = vpop.f32.mrb[101].mxu0  ;;  %v4536_v36 = vpop.f32.mrb[101].mxu1 }
 0x1cf   : > { %v2189_v37 = vmax.f32 %v2081_v26, %v2157_v29  ;;  %v2830_v38 = vmax.f32 %v2722_v28, %v2798_v30  ;;  %v4425_v39 = vadd.f32 %v4424_v35, %v4423_v31  ;;  %v4537_v40 = vadd.f32 %v4536_v36, %v4535_v32  ;;  %v4426_v41 = vpop.f32.mrb[102].mxu0  ;;  %v4538_v42 = vpop.f32.mrb[102].mxu1 }
 0x1d0   : > { %v4427_v43 = vpop.f32.mrb[103].mxu0  ;;  %v4539_v44 = vpop.f32.mrb[103].mxu1 }
 0x1d1   : > { %v3949_v45 = vpack.c.bf16 %v2189_v37, %v2188_v33  ;;  %v4029_v46 = vpack.c.bf16 %v2830_v38, %v2829_v34  ;;  %v2086_v47 = vadd.f32 %v5404_v27, %v4425_v39  ;;  %v2727_v48 = vadd.f32 %v5404_v27, %v4537_v40 }
 0x1d2   : > { %v4428_v49 = vadd.f32 %v4427_v43, %v4426_v41  ;;  %v4540_v50 = vadd.f32 %v4539_v44, %v4538_v42 }
 0x1d3   : > { %4105 = vst [vmem:[%s5295_s10 + $0x140] sm:$0xff] %v3949_v45   ;;  %4121 = vst [vmem:[%s5295_s10 + $0x1c0] sm:$0xff] %v4029_v46   ;;  %v2158_v51 = vmul.f32 0.2, %v2086_v47  ;;  %v2799_v52 = vmul.f32 0.2, %v2727_v48 }
 0x1d4   : > { %v2089_v53 = vadd.f32 %v5404_v27, %v4428_v49  ;;  %v2730_v54 = vadd.f32 %v5404_v27, %v4540_v50 }
 0x1d5   : > { %v4429_v55 = vpop.f32.mrb[104].mxu0  ;;  %v4541_v56 = vpop.f32.mrb[104].mxu1  ;;  %v2190_v2 = vmax.f32 %v2086_v47, %v2158_v51  ;;  %v2831_v3 = vmax.f32 %v2727_v48, %v2799_v52 }
 0x1d6   : > { %v2159_v57 = vmul.f32 0.2, %v2089_v53  ;;  %v2800_v58 = vmul.f32 0.2, %v2730_v54  ;;  %v4430_v59 = vpop.f32.mrb[105].mxu0  ;;  %v4542_v60 = vpop.f32.mrb[105].mxu1 }
 0x1d7   : > { %v4431_v61 = vadd.f32 %v4430_v59, %v4429_v55  ;;  %v4543_v62 = vadd.f32 %v4542_v60, %v4541_v56  ;;  %v4432_v63 = vpop.f32.mrb[106].mxu0  ;;  %v4544_v1 = vpop.f32.mrb[106].mxu1 }
 0x1d8   : > { %v2191_v4 = vmax.f32 %v2089_v53, %v2159_v57  ;;  %v2832_v5 = vmax.f32 %v2730_v54, %v2800_v58  ;;  %v4433_v6 = vpop.f32.mrb[107].mxu0  ;;  %v4545_v7 = vpop.f32.mrb[107].mxu1 }
 0x1d9   : > { %v2094_v8 = vadd.f32 %v5404_v27, %v4431_v61  ;;  %v2735_v9 = vadd.f32 %v5404_v27, %v4543_v62  ;;  %v4434_v10 = vadd.f32 %v4433_v6, %v4432_v63  ;;  %v4546_v11 = vadd.f32 %v4545_v7, %v4544_v1 }
 0x1da   : > { %v3954_v12 = vpack.c.bf16 %v2191_v4, %v2190_v2  ;;  %v4034_v13 = vpack.c.bf16 %v2832_v5, %v2831_v3 }
 0x1db   : > { %v2160_v14 = vmul.f32 0.2, %v2094_v8  ;;  %v2801_v15 = vmul.f32 0.2, %v2735_v9  ;;  %v2097_v16 = vadd.f32 %v5404_v27, %v4434_v10  ;;  %v2738_v17 = vadd.f32 %v5404_v27, %v4546_v11 }
 0x1dc   : > { %4106 = vst [vmem:[%s5295_s10 + $0x148] sm:$0xff] %v3954_v12   ;;  %4122 = vst [vmem:[%s5295_s10 + $0x1c8] sm:$0xff] %v4034_v13  }
 0x1dd   : > { %v2161_v18 = vmul.f32 0.2, %v2097_v16  ;;  %v2802_v19 = vmul.f32 0.2, %v2738_v17  ;;  %v4435_v20 = vpop.f32.mrb[108].mxu0  ;;  %v4547_v21 = vpop.f32.mrb[108].mxu1  ;;  %v2192_v22 = vmax.f32 %v2094_v8, %v2160_v14  ;;  %v2833_v23 = vmax.f32 %v2735_v9, %v2801_v15 }
 0x1de   : > { %v4436_v24 = vpop.f32.mrb[109].mxu0  ;;  %v4548_v0 = vpop.f32.mrb[109].mxu1 }
 0x1df   : > { %v2193_v25 = vmax.f32 %v2097_v16, %v2161_v18  ;;  %v2834_v26 = vmax.f32 %v2738_v17, %v2802_v19  ;;  %v4437_v28 = vadd.f32 %v4436_v24, %v4435_v20  ;;  %v4549_v29 = vadd.f32 %v4548_v0, %v4547_v21  ;;  %v4438_v30 = vpop.f32.mrb[110].mxu0  ;;  %v4550_v31 = vpop.f32.mrb[110].mxu1 }
 0x1e0   : > { %v4439_v32 = vpop.f32.mrb[111].mxu0  ;;  %v4551_v33 = vpop.f32.mrb[111].mxu1 }
 0x1e1   : > { %v3959_v34 = vpack.c.bf16 %v2193_v25, %v2192_v22  ;;  %v4039_v35 = vpack.c.bf16 %v2834_v26, %v2833_v23  ;;  %v2102_v36 = vadd.f32 %v5404_v27, %v4437_v28  ;;  %v2743_v37 = vadd.f32 %v5404_v27, %v4549_v29 }
 0x1e2   : > { %v4440_v38 = vadd.f32 %v4439_v32, %v4438_v30  ;;  %v4552_v39 = vadd.f32 %v4551_v33, %v4550_v31 }
 0x1e3   : > { %4107 = vst [vmem:[%s5295_s10 + $0x150] sm:$0xff] %v3959_v34   ;;  %4123 = vst [vmem:[%s5295_s10 + $0x1d0] sm:$0xff] %v4039_v35   ;;  %v2162_v40 = vmul.f32 0.2, %v2102_v36  ;;  %v2803_v41 = vmul.f32 0.2, %v2743_v37 }
 0x1e4   : > { %v2105_v42 = vadd.f32 %v5404_v27, %v4440_v38  ;;  %v2746_v43 = vadd.f32 %v5404_v27, %v4552_v39 }
 0x1e5   : > { %v4441_v44 = vpop.f32.mrb[112].mxu0  ;;  %v4553_v45 = vpop.f32.mrb[112].mxu1  ;;  %v2194_v54 = vmax.f32 %v2102_v36, %v2162_v40  ;;  %v2835_v55 = vmax.f32 %v2743_v37, %v2803_v41 }
 0x1e6   : > { %v2163_v46 = vmul.f32 0.2, %v2105_v42  ;;  %v2804_v47 = vmul.f32 0.2, %v2746_v43  ;;  %v4442_v48 = vpop.f32.mrb[113].mxu0  ;;  %v4554_v49 = vpop.f32.mrb[113].mxu1 }
 0x1e7   : > { %v4443_v50 = vadd.f32 %v4442_v48, %v4441_v44  ;;  %v4555_v51 = vadd.f32 %v4554_v49, %v4553_v45  ;;  %v4444_v52 = vpop.f32.mrb[114].mxu0  ;;  %v4556_v53 = vpop.f32.mrb[114].mxu1 }
 0x1e8   : > { %v2195_v56 = vmax.f32 %v2105_v42, %v2163_v46  ;;  %v2836_v57 = vmax.f32 %v2746_v43, %v2804_v47  ;;  %v4445_v58 = vpop.f32.mrb[115].mxu0  ;;  %v4557_v59 = vpop.f32.mrb[115].mxu1 }
 0x1e9   : > { %v2110_v60 = vadd.f32 %v5404_v27, %v4443_v50  ;;  %v2751_v61 = vadd.f32 %v5404_v27, %v4555_v51  ;;  %v4446_v62 = vadd.f32 %v4445_v58, %v4444_v52  ;;  %v4558_v63 = vadd.f32 %v4557_v59, %v4556_v53 }
 0x1ea   : > { %v3964_v1 = vpack.c.bf16 %v2195_v56, %v2194_v54  ;;  %v4044_v2 = vpack.c.bf16 %v2836_v57, %v2835_v55 }
 0x1eb   : > { %v2164_v3 = vmul.f32 0.2, %v2110_v60  ;;  %v2805_v4 = vmul.f32 0.2, %v2751_v61  ;;  %v2113_v5 = vadd.f32 %v5404_v27, %v4446_v62  ;;  %v2754_v6 = vadd.f32 %v5404_v27, %v4558_v63 }
 0x1ec   : > { %4108 = vst [vmem:[%s5295_s10 + $0x158] sm:$0xff] %v3964_v1   ;;  %4124 = vst [vmem:[%s5295_s10 + $0x1d8] sm:$0xff] %v4044_v2  }
 0x1ed   : > { %v2165_v7 = vmul.f32 0.2, %v2113_v5  ;;  %v2806_v8 = vmul.f32 0.2, %v2754_v6  ;;  %v4447_v9 = vpop.f32.mrb[116].mxu0  ;;  %v4559_v10 = vpop.f32.mrb[116].mxu1  ;;  %v2196_v11 = vmax.f32 %v2110_v60, %v2164_v3  ;;  %v2837_v12 = vmax.f32 %v2751_v61, %v2805_v4 }
 0x1ee   : > { %v4448_v13 = vpop.f32.mrb[117].mxu0  ;;  %v4560_v14 = vpop.f32.mrb[117].mxu1 }
 0x1ef   : > { %v2197_v15 = vmax.f32 %v2113_v5, %v2165_v7  ;;  %v2838_v16 = vmax.f32 %v2754_v6, %v2806_v8  ;;  %v4449_v17 = vadd.f32 %v4448_v13, %v4447_v9  ;;  %v4561_v18 = vadd.f32 %v4560_v14, %v4559_v10  ;;  %v4450_v19 = vpop.f32.mrb[118].mxu0  ;;  %v4562_v20 = vpop.f32.mrb[118].mxu1 }
 0x1f0   : > { %v4451_v21 = vpop.f32.mrb[119].mxu0  ;;  %v4563_v22 = vpop.f32.mrb[119].mxu1 }
 0x1f1   : > { %v3969_v23 = vpack.c.bf16 %v2197_v15, %v2196_v11  ;;  %v4049_v24 = vpack.c.bf16 %v2838_v16, %v2837_v12  ;;  %v2118_v0 = vadd.f32 %v5404_v27, %v4449_v17  ;;  %v2759_v25 = vadd.f32 %v5404_v27, %v4561_v18 }
 0x1f2   : > { %v4452_v26 = vadd.f32 %v4451_v21, %v4450_v19  ;;  %v4564_v28 = vadd.f32 %v4563_v22, %v4562_v20 }
 0x1f3   : > { %4109 = vst [vmem:[%s5295_s10 + $0x160] sm:$0xff] %v3969_v23   ;;  %4125 = vst [vmem:[%s5295_s10 + $0x1e0] sm:$0xff] %v4049_v24   ;;  %v2166_v29 = vmul.f32 0.2, %v2118_v0  ;;  %v2807_v30 = vmul.f32 0.2, %v2759_v25 }
 0x1f4   : > { %v2121_v31 = vadd.f32 %v5404_v27, %v4452_v26  ;;  %v2762_v32 = vadd.f32 %v5404_v27, %v4564_v28 }
 0x1f5   : > { %v4453_v33 = vpop.f32.mrb[120].mxu0  ;;  %v4565_v34 = vpop.f32.mrb[120].mxu1  ;;  %v2198_v43 = vmax.f32 %v2118_v0, %v2166_v29  ;;  %v2839_v44 = vmax.f32 %v2759_v25, %v2807_v30 }
 0x1f6   : > { %v2167_v35 = vmul.f32 0.2, %v2121_v31  ;;  %v2808_v36 = vmul.f32 0.2, %v2762_v32  ;;  %v4454_v37 = vpop.f32.mrb[121].mxu0  ;;  %v4566_v38 = vpop.f32.mrb[121].mxu1 }
 0x1f7   : > { %v4455_v39 = vadd.f32 %v4454_v37, %v4453_v33  ;;  %v4567_v40 = vadd.f32 %v4566_v38, %v4565_v34  ;;  %v4456_v41 = vpop.f32.mrb[122].mxu0  ;;  %v4568_v42 = vpop.f32.mrb[122].mxu1 }
 0x1f8   : > { %v2199_v45 = vmax.f32 %v2121_v31, %v2167_v35  ;;  %v2840_v46 = vmax.f32 %v2762_v32, %v2808_v36  ;;  %v4457_v47 = vpop.f32.mrb[123].mxu0  ;;  %v4569_v48 = vpop.f32.mrb[123].mxu1 }
 0x1f9   : > { %v2126_v49 = vadd.f32 %v5404_v27, %v4455_v39  ;;  %v2767_v50 = vadd.f32 %v5404_v27, %v4567_v40  ;;  %v4458_v51 = vadd.f32 %v4457_v47, %v4456_v41  ;;  %v4570_v52 = vadd.f32 %v4569_v48, %v4568_v42 }
 0x1fa   : > { %v3974_v53 = vpack.c.bf16 %v2199_v45, %v2198_v43  ;;  %v4054_v54 = vpack.c.bf16 %v2840_v46, %v2839_v44 }
 0x1fb   : > { %v2168_v55 = vmul.f32 0.2, %v2126_v49  ;;  %v2809_v56 = vmul.f32 0.2, %v2767_v50  ;;  %v2129_v57 = vadd.f32 %v5404_v27, %v4458_v51  ;;  %v2770_v58 = vadd.f32 %v5404_v27, %v4570_v52 }
 0x1fc   : > { %4110 = vst [vmem:[%s5295_s10 + $0x168] sm:$0xff] %v3974_v53   ;;  %4126 = vst [vmem:[%s5295_s10 + $0x1e8] sm:$0xff] %v4054_v54  }
 0x1fd   : > { %v2169_v59 = vmul.f32 0.2, %v2129_v57  ;;  %v2810_v60 = vmul.f32 0.2, %v2770_v58  ;;  %v4459_v61 = vpop.f32.mrb[124].mxu0  ;;  %v4571_v62 = vpop.f32.mrb[124].mxu1  ;;  %v2200_v63 = vmax.f32 %v2126_v49, %v2168_v55  ;;  %v2841_v1 = vmax.f32 %v2767_v50, %v2809_v56 }
 0x1fe   : > { %v4460_v2 = vpop.f32.mrb[125].mxu0  ;;  %v4572_v3 = vpop.f32.mrb[125].mxu1 }
 0x1ff   : > { %v2201_v4 = vmax.f32 %v2129_v57, %v2169_v59  ;;  %v2842_v5 = vmax.f32 %v2770_v58, %v2810_v60  ;;  %v4461_v6 = vadd.f32 %v4460_v2, %v4459_v61  ;;  %v4573_v7 = vadd.f32 %v4572_v3, %v4571_v62  ;;  %v4462_v8 = vpop.f32.mrb[126].mxu0  ;;  %v4574_v9 = vpop.f32.mrb[126].mxu1 }
 0x200   : > { %v4463_v10 = vpop.f32.mrb[127].mxu0  ;;  %v4575_v11 = vpop.f32.mrb[127].mxu1 }
 0x201   : > { %v3979_v12 = vpack.c.bf16 %v2201_v4, %v2200_v63  ;;  %v4059_v13 = vpack.c.bf16 %v2842_v5, %v2841_v1  ;;  %v2134_v14 = vadd.f32 %v5404_v27, %v4461_v6  ;;  %v2775_v15 = vadd.f32 %v5404_v27, %v4573_v7 }
 0x202   : > { %v4464_v16 = vadd.f32 %v4463_v10, %v4462_v8  ;;  %v4576_v17 = vadd.f32 %v4575_v11, %v4574_v9 }
 0x203   : > { %4111 = vst [vmem:[%s5295_s10 + $0x170] sm:$0xff] %v3979_v12   ;;  %4127 = vst [vmem:[%s5295_s10 + $0x1f0] sm:$0xff] %v4059_v13   ;;  %v2170_v18 = vmul.f32 0.2, %v2134_v14  ;;  %v2811_v19 = vmul.f32 0.2, %v2775_v15 }
 0x204   : > { %v2137_v20 = vadd.f32 %v5404_v27, %v4464_v16  ;;  %v2778_v21 = vadd.f32 %v5404_v27, %v4576_v17 }
 0x205   : > { %v2202_v24 = vmax.f32 %v2134_v14, %v2170_v18  ;;  %v2843_v0 = vmax.f32 %v2775_v15, %v2811_v19 }
 0x206   : > { %v2171_v22 = vmul.f32 0.2, %v2137_v20  ;;  %v2812_v23 = vmul.f32 0.2, %v2778_v21 }
 0x208   : > { %v2203_v25 = vmax.f32 %v2137_v20, %v2171_v22  ;;  %v2844_v26 = vmax.f32 %v2778_v21, %v2812_v23 }
 0x20a   : > { %v3984_v27 = vpack.c.bf16 %v2203_v25, %v2202_v24  ;;  %v4064_v28 = vpack.c.bf16 %v2844_v26, %v2843_v0 }
 0x20c   : > { %4112 = vst [vmem:[%s5295_s10 + $0x178] sm:$0xff] %v3984_v27   ;;  %4128 = vst [vmem:[%s5295_s10 + $0x1f8] sm:$0xff] %v4064_v28  }
 0x20d   : > { %4809 = shalt.err (!%p4806_p9)
}
 0x20e   : > { %s4810_s30 = scalar_lea.hbm %s5502_s12, 8192  ;;  %s4814_s9 = scalar_lea.hbm %s5566_s4, 65536 }
 0x20f   : > { %p4811_p10 = scmp.ne.s32.totalorder %s5502_s12, %s4810_s30  ;;  %p4815_p13 = scmp.lt.u32.totalorder %s5502_s12, %s5566_s4 }
 0x210   : > { %p4816_p0 = scmp.lt.u32.totalorder %s4814_s9, %s4810_s30  ;;  %p4818_p2 = scmp.lt.u32.totalorder %s4810_s30, %s5502_s12 }
 0x211   : > { %p4812_p11 = pnand %p4811_p10, %p4971_p3 }
 0x212   : > { %p4817_p1 = por %p4816_p0, %p4815_p13 }
 0x213   : > { %p4813_p12 = pneg %p4812_p11 }
 0x214   : > { %p4819_p4 = por %p4818_p2, %p4817_p1 }
 0x216   : > { %p4820_p5 = pnand %p4819_p4, %p4813_p12 }
 0x218   : > { %4823 = shalt.err (!%p4820_p5)
}
 0x219   : > { %s4893_s8 = smov 64   ;;  %s4894_s11 = smov 4  }
 0x21a   : > { %4578 = dma.vmem_to_hbm [thread:$0]  (%p4971_p3), %s5504_s19, 8192, %s5502_s12, %s5510_s14, %s4893_s8, %s4893_s8, %s4894_s11  }
 0x21b PF: > { %p4584_p6 = scmp.ge.s32.totalorder %s4890_s22, 2  ;;  %s3036_s23 = sand.u32 1, %s4862_s15  }
 0x21c   : > { %s3037_s5 = scalar_lea.sflag [#allocation3], %s3036_s23 }
 0x21d   : > { %p4581_p7 = pnand %p4584_p6, %p4980_p8 }
 0x21f   : > { %4857 = dma.done.wait (!%p4581_p7), %s3037_s5, 8192  }
 0x220   : > { %4859 = vsyncadd (!%p4581_p7), %s3037_s5, 4294959104  ;;  %s17_s22 = sadd.s32 1, %s4890_s22   ;;  %s5569_s15 = smov %s4866_s16 }
 0x221   : > { %p14_p9 = scmp.ge.s32.totalorder %s17_s22, 10   ;;  %s5570_s16 = smov %s4870_s17 }
 0x222   : > { %s5571_s17 = smov %s4989_s7  ;;  %s5572_s18 = smov %s4882_s20 }
 0x223   : > { %s5573_s19 = smov %s4886_s21  ;;  %s5574_s20 = smov %s5577_s25 }
 0x224   : > { %s5575_s21 = smov %s5581_s26  ;;  %16 = sbr.rel (!%p14_p9) target bundleno = 5 (0x5), region = 77 }
 0x22b   :  { %3042 = vsyncpa [#allocation3], 1 }
 0x22c   :  { %3044 = vsyncpa [#allocation3 + $0x1], 1 }

</bundles_post_ra>
